<compile_context>
chip_gen: v7x
topology: tpu7x:2x2x1
jax: 0.10.0
libtpu: 0.0.40
codegen_flags: <defaults>
</compile_context>

<pallas_src>
import functools

import jax
import jax.numpy as jnp
from jax import lax
from jax.experimental import pallas as pl
from jax.experimental.pallas import tpu as pltpu


def _round_up(v, m):
    return (v + m - 1) // m * m


def _pick_tile(n, t=128):
    # TODO(synk): pad ragged N instead of falling back to a whole-array tile.
    return t if n % t == 0 else n


def _vmem_limit(need_bytes):
    # Explicit scoped-VMEM budget with headroom; never below the v6e/v7x
    # default (32 MiB) and capped well under every generation's physical VMEM.
    return int(min(100 * 2**20, max(32 * 2**20, int(1.5 * need_bytes))))


# ------------------------- Encoder kernel (gc1 + gc2||gc3) -------------------

def _encoder_kernel(x_ref, adj_ref, w1p_ref, w23p_ref,
                    muvar_ref, zmask_ref, s2_ref, *, h2, tn):
    i = pl.program_id(0)

    # s2 = relu(adj @ (x @ W1)) @ [W2 || W3] is needed in full by every muvar
    # row tile; compute it once into persistent VMEM scratch.  adj is already
    # fully resident in VMEM, so this is pure MXU work (no extra HBM traffic).
    @pl.when(i == 0)
    def _():
        s1 = jnp.dot(x_ref[...], w1p_ref[...],
                     preferred_element_type=jnp.float32)
        h1 = jnp.maximum(
            jnp.dot(adj_ref[...], s1.astype(jnp.bfloat16),
                    preferred_element_type=jnp.float32), 0.0)
        s2_ref[...] = jnp.dot(h1.astype(jnp.bfloat16), w23p_ref[...],
                              preferred_element_type=jnp.float32
                              ).astype(jnp.bfloat16)

    # gc2 || gc3 propagate for this output-row tile: adj[rows, :] @ s2.
    row0 = pl.multiple_of(i * tn, tn)
    adj_rows = adj_ref[pl.ds(row0, tn), :]
    muvar = jnp.dot(adj_rows, s2_ref[...], preferred_element_type=jnp.float32)
    muvar_ref[...] = muvar.astype(muvar_ref.dtype)        # lane-dense f32 slab

    # Lane-dense bf16 z slab for the decoder: keep the mu lanes, zero the
    # logvar / padding lanes so the decoder can contract the full 128 lanes
    # and still be numerically exact.
    col = lax.broadcasted_iota(jnp.int32, muvar.shape, 1)
    zmask_ref[...] = jnp.where(col < h2, muvar, 0.0).astype(zmask_ref.dtype)


# ------------------------- Decoder kernel (z @ z.T) --------------------------

def _decoder_kernel(zi_ref, zj_ref, recon_ref):
    # recon tile = z_i @ z_j.T, expressed as a dot_general contracting the
    # last (zero-padded) dims of both operands -- no transpose materialized.
    recon = lax.dot_general(zi_ref[...], zj_ref[...],
                            (((1,), (1,)), ((), ())),
                            preferred_element_type=jnp.float32)
    recon_ref[...] = recon.astype(recon_ref.dtype)


# ------------------------- Fused forward wrapper -----------------------------

def gcn_model_vae_fused(params, x, adj):
    n, f = x.shape
    h1 = params["w1"].shape[1]
    h2 = params["w2"].shape[1]
    h1p = _round_up(h1, 128)          # hidden1 width padded to full lane width
    outp = _round_up(2 * h2, 128)     # mu||logvar width padded to full lane width
    tn = _pick_tile(n)                # encoder output-row tile
    tb = _pick_tile(n)                # decoder tile (rows and cols)

    # bf16 MXU operands at the kernel boundary (halves adj HBM traffic);
    # all accumulation inside the kernels stays f32.
    x_bf = x.astype(jnp.bfloat16)
    adj_bf = adj.astype(jnp.bfloat16)
    w1p = jnp.zeros((f, h1p), jnp.bfloat16).at[:, :h1].set(
        params["w1"].astype(jnp.bfloat16))
    w23 = jnp.concatenate([params["w2"], params["w3"]], axis=1)   # (H1, 2*H2)
    w23p = jnp.zeros((h1p, outp), jnp.bfloat16).at[:h1, :2 * h2].set(
        w23.astype(jnp.bfloat16))

    # ---------------- encoder: gc1 -> gc2||gc3, row-tiled -------------------
    enc_flops = 2 * (n * f * h1p + n * n * h1p + n * h1p * outp + n * n * outp)
    enc_bytes = 2 * (n * n + n * f + f * h1p + h1p * outp) + n * outp * (4 + 2)
    enc_need = (2 * (n * n + n * f + f * h1p + h1p * outp)  # resident bf16 inputs
                + 2 * n * outp                              # s2 scratch (bf16)
                + 8 * n * h1p                               # step-0 f32 temporaries
                + 2 * (tn * outp * 4 + tn * outp * 2))      # double-buffered outputs

    enc_kernel = functools.partial(_encoder_kernel, h2=h2, tn=tn)
    muvar, zmask = pl.pallas_call(
        enc_kernel,
        out_shape=(
            jax.ShapeDtypeStruct((n, outp), jnp.float32),   # mu || logvar, lane-dense
            jax.ShapeDtypeStruct((n, outp), jnp.bfloat16),  # masked z for the decoder
        ),
        grid_spec=pltpu.PrefetchScalarGridSpec(
            num_scalar_prefetch=0,
            grid=(n // tn,),
            in_specs=[
                pl.BlockSpec((n, f), lambda i: (0, 0)),
                pl.BlockSpec((n, n), lambda i: (0, 0)),      # adj resident, DMA'd once
                pl.BlockSpec((f, h1p), lambda i: (0, 0)),
                pl.BlockSpec((h1p, outp), lambda i: (0, 0)),
            ],
            out_specs=(
                pl.BlockSpec((tn, outp), lambda i: (i, 0)),
                pl.BlockSpec((tn, outp), lambda i: (i, 0)),
            ),
            scratch_shapes=[pltpu.VMEM((n, outp), jnp.bfloat16)],
        ),
        compiler_params=pltpu.CompilerParams(
            # "arbitrary": grid step 0 fills the persistent s2 scratch that
            # later steps consume, so the row axis must run in order.
            dimension_semantics=("arbitrary",),
            vmem_limit_bytes=_vmem_limit(enc_need)),
        cost_estimate=pl.CostEstimate(flops=enc_flops, transcendentals=0,
                                      bytes_accessed=enc_bytes),
    )(x_bf, adj_bf, w1p, w23p)

    mu = muvar[:, :h2]                # lane-dense slab sliced outside the kernel
    logvar = muvar[:, h2:2 * h2]
    z = mu                            # eval-mode reparameterize
    # TODO(synk): training-mode dropout and z = eps*exp(logvar) + mu are
    # stochastic and intentionally not implemented (eval semantics only).

    # ---------------- decoder: recon = z @ z.T, (i, j)-tiled -----------------
    nt = n // tb
    dec_flops = 2 * n * n * outp
    dec_bytes = 2 * nt * n * outp * 2 + n * n * 2
    dec_need = 2 * 2 * (tb * outp * 2) + 2 * (tb * tb * 2)

    recon = pl.pallas_call(
        _decoder_kernel,
        out_shape=jax.ShapeDtypeStruct((n, n), jnp.bfloat16),   # bf16 logits
        grid_spec=pltpu.PrefetchScalarGridSpec(
            num_scalar_prefetch=0,
            grid=(nt, nt),
            in_specs=[
                pl.BlockSpec((tb, outp), lambda i, j: (i, 0)),
                pl.BlockSpec((tb, outp), lambda i, j: (j, 0)),
            ],
            out_specs=pl.BlockSpec((tb, tb), lambda i, j: (i, j)),
        ),
        compiler_params=pltpu.CompilerParams(
            dimension_semantics=("parallel", "parallel"),   # megacore on v7x
            vmem_limit_bytes=_vmem_limit(dec_need)),
        cost_estimate=pl.CostEstimate(flops=dec_flops, transcendentals=0,
                                      bytes_accessed=dec_bytes),
    )(zmask, zmask)
    # TODO(synk): a j>=i triangular-packed decoder grid (scalar-prefetched tile
    # coords) would halve decoder MXU work, but mirroring the result in the
    # wrapper re-reads/writes the full NxN matrix and costs more HBM bytes than
    # it saves unless the downstream loss consumes the triangular form directly.

    return recon, z, mu, logvar


# ------------------------- Model wrapper -------------------------------------

def xavier_uniform(key, fan_in, fan_out):
    bound = jnp.sqrt(6.0 / (fan_in + fan_out)).astype(jnp.float32)
    return jax.random.uniform(
        key, (fan_in, fan_out), dtype=jnp.float32, minval=-bound, maxval=bound
    )


def init_params(key, input_feat_dim, hidden1, hidden2):
    k1, k2, k3 = jax.random.split(key, 3)
    return {
        "w1": xavier_uniform(k1, input_feat_dim, hidden1),
        "w2": xavier_uniform(k2, hidden1, hidden2),
        "w3": xavier_uniform(k3, hidden1, hidden2),
    }


@jax.jit
def gcn_model_vae_forward(params, x, adj):
    return gcn_model_vae_fused(params, x, adj)


# ------------------------------ main ------------------------------------------

if __name__ == "__main__":
    N = 256            # number of graph nodes (2 encoder row tiles, 2x2 decoder tiles)
    INPUT_FEAT = 64    # input_feat_dim
    HIDDEN1 = 64       # args.hidden1
    HIDDEN2 = 32       # args.hidden2

    key = jax.random.PRNGKey(0)
    k_params, k_x, k_adj = jax.random.split(key, 3)

    params = init_params(k_params, INPUT_FEAT, HIDDEN1, HIDDEN2)
    x = jax.random.normal(k_x, (N, INPUT_FEAT), dtype=jnp.float32)

    # Deterministic symmetric normalized adjacency (dense stand-in for the
    # torch.sparse.mm operand).
    a = (jax.random.uniform(k_adj, (N, N)) < 0.05).astype(jnp.float32)
    a = jnp.maximum(a, a.T)
    a = a + jnp.eye(N, dtype=jnp.float32)          # add self-loops
    deg = jnp.sum(a, axis=1)
    d_inv_sqrt = 1.0 / jnp.sqrt(deg)
    adj = a * d_inv_sqrt[:, None] * d_inv_sqrt[None, :]

    recon, z, mu, logvar = gcn_model_vae_forward(params, x, adj)
    jax.block_until_ready((recon, z, mu, logvar))

    assert recon.shape == (N, N) and recon.dtype == jnp.bfloat16
    assert z.shape == (N, HIDDEN2)
    assert mu.shape == (N, HIDDEN2)
    assert logvar.shape == (N, HIDDEN2)
    assert bool(jnp.all(jnp.isfinite(recon.astype(jnp.float32))))
    assert bool(jnp.all(jnp.isfinite(logvar)))

    # f32 reference with a bf16-appropriate tolerance (bf16 MXU operands).
    s1_ref = x @ params["w1"]
    h1_ref = jnp.maximum(adj @ s1_ref, 0.0)
    mu_ref = adj @ (h1_ref @ params["w2"])
    logvar_ref = adj @ (h1_ref @ params["w3"])
    recon_ref = mu_ref @ mu_ref.T

    def close(got, want, tol=0.06):
        got = got.astype(jnp.float32)
        return bool(jnp.max(jnp.abs(got - want)) <=
                    tol * (jnp.max(jnp.abs(want)) + 1e-6))

    assert close(mu, mu_ref)
    assert close(logvar, logvar_ref)
    assert close(recon, recon_ref)

    print("KERNEL_OK")
</pallas_src>

<mosaic_0001>
module attributes {stable_mosaic.version = 11 : i64} {
  func.func @_encoder_kernel(%arg0: i32, %arg1: memref<256x64xbf16, #tpu.memory_space<vmem>>, %arg2: memref<256x256xbf16, #tpu.memory_space<vmem>>, %arg3: memref<64x128xbf16, #tpu.memory_space<vmem>>, %arg4: memref<128x128xbf16, #tpu.memory_space<vmem>>, %arg5: memref<128x128xf32, #tpu.memory_space<vmem>>, %arg6: memref<128x128xbf16, #tpu.memory_space<vmem>>, %arg7: memref<256x128xbf16, #tpu.memory_space<vmem>>) attributes {dimension_semantics = [#tpu.dimension_semantics<arbitrary>], iteration_bounds = array<i64: 2>, scalar_prefetch = 0 : i64, scratch_operands = 1 : i64, tpu.core_type = #tpu.core_type<tc>, window_params = [{pipeline_mode = #tpu.pipeline_mode<synchronous>, transform_indices = @transform_0, window_bounds = array<i64: 256, 64>}, {pipeline_mode = #tpu.pipeline_mode<synchronous>, transform_indices = @transform_1, window_bounds = array<i64: 256, 256>}, {pipeline_mode = #tpu.pipeline_mode<synchronous>, transform_indices = @transform_2, window_bounds = array<i64: 64, 128>}, {pipeline_mode = #tpu.pipeline_mode<synchronous>, transform_indices = @transform_3, window_bounds = array<i64: 128, 128>}, {transform_indices = @transform_4, window_bounds = array<i64: 128, 128>}, {transform_indices = @transform_5, window_bounds = array<i64: 128, 128>}]} {
    %c0_i32 = arith.constant 0 : i32
    %0 = arith.cmpi eq, %arg0, %c0_i32 : i32
    %1 = arith.extui %0 : i1 to i32
    %c0_i32_0 = arith.constant 0 : i32
    %2 = arith.cmpi ne, %1, %c0_i32_0 : i32
    scf.if %2 {
      %c0_8 = arith.constant 0 : index
      %c0_9 = arith.constant 0 : index
      %17 = vector.load %arg1[%c0_8, %c0_9] : memref<256x64xbf16, #tpu.memory_space<vmem>>, vector<256x64xbf16>
      %c0_10 = arith.constant 0 : index
      %c0_11 = arith.constant 0 : index
      %18 = vector.load %arg3[%c0_10, %c0_11] : memref<64x128xbf16, #tpu.memory_space<vmem>>, vector<64x128xbf16>
      %cst_12 = arith.constant dense<0.000000e+00> : vector<256x128xf32>
      %19 = tpu.matmul %17, %18, %cst_12 {dimension_numbers = #tpu.dot_dimension_numbers<[1], [0], [0], [1], [0, 0, 1, 1], [], []>} : vector<256x64xbf16>, vector<64x128xbf16>, vector<256x128xf32> -> vector<256x128xf32>
      %c0_13 = arith.constant 0 : index
      %c0_14 = arith.constant 0 : index
      %20 = vector.load %arg2[%c0_13, %c0_14] : memref<256x256xbf16, #tpu.memory_space<vmem>>, vector<256x256xbf16>
      %21 = arith.truncf %19 : vector<256x128xf32> to vector<256x128xbf16>
      %cst_15 = arith.constant dense<0.000000e+00> : vector<256x128xf32>
      %22 = tpu.matmul %20, %21, %cst_15 {dimension_numbers = #tpu.dot_dimension_numbers<[1], [0], [0], [1], [0, 0, 1, 1], [], []>} : vector<256x256xbf16>, vector<256x128xbf16>, vector<256x128xf32> -> vector<256x128xf32>
      %cst_16 = arith.constant 0.000000e+00 : f32
      %23 = vector.broadcast %cst_16 : f32 to vector<256x128xf32>
      %24 = arith.maximumf %22, %23 : vector<256x128xf32>
      %25 = arith.truncf %24 : vector<256x128xf32> to vector<256x128xbf16>
      %c0_17 = arith.constant 0 : index
      %c0_18 = arith.constant 0 : index
      %26 = vector.load %arg4[%c0_17, %c0_18] : memref<128x128xbf16, #tpu.memory_space<vmem>>, vector<128x128xbf16>
      %cst_19 = arith.constant dense<0.000000e+00> : vector<256x128xf32>
      %27 = tpu.matmul %25, %26, %cst_19 {dimension_numbers = #tpu.dot_dimension_numbers<[1], [0], [0], [1], [0, 0, 1, 1], [], []>} : vector<256x128xbf16>, vector<128x128xbf16>, vector<256x128xf32> -> vector<256x128xf32>
      %28 = arith.truncf %27 : vector<256x128xf32> to vector<256x128xbf16>
      %c0_20 = arith.constant 0 : index
      %c0_21 = arith.constant 0 : index
      %29 = vector.load %arg7[%c0_20, %c0_21] : memref<256x128xbf16, #tpu.memory_space<vmem>>, vector<256x128xbf16>
      tpu.vector_store %arg7[%c0_20, %c0_21], %28 {strides = array<i32>} : memref<256x128xbf16, #tpu.memory_space<vmem>>, vector<256x128xbf16>,
    } else {
    }
    %c128_i32 = arith.constant 128 : i32
    %3 = arith.muli %arg0, %c128_i32 : i32
    %4 = tpu.assume_multiple %3, 128 : i32
    %5 = arith.index_cast %4 : i32 to index
    %c0 = arith.constant 0 : index
    %6 = vector.load %arg2[%5, %c0] : memref<256x256xbf16, #tpu.memory_space<vmem>>, vector<128x256xbf16>
    %c0_1 = arith.constant 0 : index
    %c0_2 = arith.constant 0 : index
    %7 = vector.load %arg7[%c0_1, %c0_2] : memref<256x128xbf16, #tpu.memory_space<vmem>>, vector<256x128xbf16>
    %cst = arith.constant dense<0.000000e+00> : vector<128x128xf32>
    %8 = tpu.matmul %6, %7, %cst {dimension_numbers = #tpu.dot_dimension_numbers<[1], [0], [0], [1], [0, 0, 1, 1], [], []>} : vector<128x256xbf16>, vector<256x128xbf16>, vector<128x128xf32> -> vector<128x128xf32>
    %c0_3 = arith.constant 0 : index
    %c0_4 = arith.constant 0 : index
    %9 = vector.load %arg5[%c0_3, %c0_4] : memref<128x128xf32, #tpu.memory_space<vmem>>, vector<128x128xf32>
    tpu.vector_store %arg5[%c0_3, %c0_4], %8 {strides = array<i32>} : memref<128x128xf32, #tpu.memory_space<vmem>>, vector<128x128xf32>,
    %10 = tpu.iota {dimensions = array<i32: 1>} : vector<128x128xi32>
    %c32_i32 = arith.constant 32 : i32
    %11 = vector.broadcast %c32_i32 : i32 to vector<128x128xi32>
    %12 = arith.cmpi slt, %10, %11 : vector<128x128xi32>
    %cst_5 = arith.constant 0.000000e+00 : f32
    %13 = vector.broadcast %cst_5 : f32 to vector<128x128xf32>
    %14 = arith.select %12, %8, %13 : vector<128x128xi1>, vector<128x128xf32>
    %15 = arith.truncf %14 : vector<128x128xf32> to vector<128x128xbf16>
    %c0_6 = arith.constant 0 : index
    %c0_7 = arith.constant 0 : index
    %16 = vector.load %arg6[%c0_6, %c0_7] : memref<128x128xbf16, #tpu.memory_space<vmem>>, vector<128x128xbf16>
    tpu.vector_store %arg6[%c0_6, %c0_7], %15 {strides = array<i32>} : memref<128x128xbf16, #tpu.memory_space<vmem>>, vector<128x128xbf16>,
    return
  }
  func.func @transform_0(%arg0: i32) -> (i32, i32) {
    %c0_i32 = arith.constant 0 : i32
    %c0_i32_0 = arith.constant 0 : i32
    %c0_i32_1 = arith.constant 0 : i32
    return %c0_i32, %c0_i32_0 : i32, i32
  }
  func.func @transform_1(%arg0: i32) -> (i32, i32) {
    %c0_i32 = arith.constant 0 : i32
    %c0_i32_0 = arith.constant 0 : i32
    %c0_i32_1 = arith.constant 0 : i32
    return %c0_i32, %c0_i32_0 : i32, i32
  }
  func.func @transform_2(%arg0: i32) -> (i32, i32) {
    %c0_i32 = arith.constant 0 : i32
    %c0_i32_0 = arith.constant 0 : i32
    %c0_i32_1 = arith.constant 0 : i32
    return %c0_i32, %c0_i32_0 : i32, i32
  }
  func.func @transform_3(%arg0: i32) -> (i32, i32) {
    %c0_i32 = arith.constant 0 : i32
    %c0_i32_0 = arith.constant 0 : i32
    %c0_i32_1 = arith.constant 0 : i32
    return %c0_i32, %c0_i32_0 : i32, i32
  }
  func.func @transform_4(%arg0: i32) -> (i32, i32) {
    %c0_i32 = arith.constant 0 : i32
    %c0_i32_0 = arith.constant 0 : i32
    return %arg0, %c0_i32 : i32, i32
  }
  func.func @transform_5(%arg0: i32) -> (i32, i32) {
    %c0_i32 = arith.constant 0 : i32
    %c0_i32_0 = arith.constant 0 : i32
    return %arg0, %c0_i32 : i32, i32
  }
}

module attributes {stable_mosaic.version = 11 : i64} {
  func.func @_decoder_kernel(%arg0: i32, %arg1: i32, %arg2: memref<128x128xbf16, #tpu.memory_space<vmem>>, %arg3: memref<128x128xbf16, #tpu.memory_space<vmem>>, %arg4: memref<128x128xbf16, #tpu.memory_space<vmem>>) attributes {dimension_semantics = [#tpu.dimension_semantics<parallel>, #tpu.dimension_semantics<parallel>], iteration_bounds = array<i64: 2, 2>, scalar_prefetch = 0 : i64, scratch_operands = 0 : i64, tpu.core_type = #tpu.core_type<tc>, window_params = [{transform_indices = @transform_0, window_bounds = array<i64: 128, 128>}, {transform_indices = @transform_1, window_bounds = array<i64: 128, 128>}, {transform_indices = @transform_2, window_bounds = array<i64: 128, 128>}]} {
    %c0 = arith.constant 0 : index
    %c0_0 = arith.constant 0 : index
    %0 = vector.load %arg2[%c0, %c0_0] : memref<128x128xbf16, #tpu.memory_space<vmem>>, vector<128x128xbf16>
    %c0_1 = arith.constant 0 : index
    %c0_2 = arith.constant 0 : index
    %1 = vector.load %arg3[%c0_1, %c0_2] : memref<128x128xbf16, #tpu.memory_space<vmem>>, vector<128x128xbf16>
    %cst = arith.constant dense<0.000000e+00> : vector<128x128xf32>
    %2 = tpu.matmul %0, %1, %cst {dimension_numbers = #tpu.dot_dimension_numbers<[1], [1], [0], [0], [0, 0, 1, 0], [], []>} : vector<128x128xbf16>, vector<128x128xbf16>, vector<128x128xf32> -> vector<128x128xf32>
    %3 = arith.truncf %2 : vector<128x128xf32> to vector<128x128xbf16>
    %c0_3 = arith.constant 0 : index
    %c0_4 = arith.constant 0 : index
    %4 = vector.load %arg4[%c0_3, %c0_4] : memref<128x128xbf16, #tpu.memory_space<vmem>>, vector<128x128xbf16>
    tpu.vector_store %arg4[%c0_3, %c0_4], %3 {strides = array<i32>} : memref<128x128xbf16, #tpu.memory_space<vmem>>, vector<128x128xbf16>,
    return
  }
  func.func @transform_0(%arg0: i32, %arg1: i32) -> (i32, i32) {
    %c0_i32 = arith.constant 0 : i32
    %c0_i32_0 = arith.constant 0 : i32
    return %arg0, %c0_i32 : i32, i32
  }
  func.func @transform_1(%arg0: i32, %arg1: i32) -> (i32, i32) {
    %c0_i32 = arith.constant 0 : i32
    %c0_i32_0 = arith.constant 0 : i32
    return %arg1, %c0_i32 : i32, i32
  }
  func.func @transform_2(%arg0: i32, %arg1: i32) -> (i32, i32) {
    %c0_i32 = arith.constant 0 : i32
    return %arg0, %arg1 : i32, i32
  }
}

</mosaic_0001>

<bundles_post_ra>
// kernel: gcn_model_vae_forward.3
= control target key start
LH: loop header
LB: loop body
LE: loop exit
PB: predicated region body
PF: predicated region fallthrough
CT: control target
= control target key end

     0   :  { %7 = vsyncpa [#allocation3], 0  ;;  %s1136_s0 = inlined_call_operand.vmem [shape: bf16[256,128], index: 0, kind: input, shape index: {}, may-alias: {0,1}]   ;;  %s1137_s1 = inlined_call_operand.vmem [shape: bf16[256,128], index: 1, kind: input, shape index: {}, may-alias: {0,1}]   ;;  %s1138_s2 = inlined_call_operand.hbm [shape: bf16[256,256], index: 2, kind: output, shape index: {}]  }
   0x1   :  { %9 = vsyncpa [#allocation3 + $0x1], 0  ;;  %s971_s9 = smov 0   ;;  %s973_s10 = smov 0  }
   0x2   :  { %s975_s11 = smov 0   ;;  %s977_s12 = smov 0  }
   0x3   :  { %s979_s13 = smov 0   ;;  %s981_s14 = smov 0  }
   0x4   :  { %s983_s15 = smov 0   ;;  %s985_s16 = smov 0  }
   0x5 LB: > { %s590_s17 = sadd.s32 4294967295, %s950_s16   ;;  %s591_s18 = sadd.s32 4294967294, %s950_s16   ;;  %s950_s16 = sphi %s985_s16, %s15_s16   ;;  %s946_s15 = sphi %s983_s15, %s1147_s15   ;;  %s942_s14 = sphi %s981_s14, %s1146_s14   ;;  %s938_s13 = sphi %s979_s13, %s1145_s13   ;;  %s934_s12 = sphi %s977_s12, %s1144_s12   ;;  %s930_s11 = sphi %s975_s11, %s1143_s11   ;;  %s926_s10 = sphi %s973_s10, %s1142_s10   ;;  %s922_s9 = sphi %s971_s9, %s1141_s9  }
   0x6   : > { %s24_s19 = sadd.s32 1, %s942_s14  ;;  %s27_s20 = sadd.s32 1, %s946_s15 }
   0x7   : > { %p25_p0 = scmp.ge.s32.totalorder %s24_s19, 2  ;;  %p98_p1 = scmp.ne.s32.totalorder %s930_s11, %s926_s10 }
   0x8   : > { %p99_p2 = scmp.eq.s32.totalorder %s590_s17, 3  ;;  %p104_p5 = scmp.ne.s32.totalorder %s926_s10, %s922_s9 }
   0x9   : > { %s1149_s19 = smov (%p25_p0, %s24_s19), 0  ;;  %s1151_s20 = smov (!%p25_p0, %s27_s20), %s946_s15 }
   0xa   : > { %s84_s21 = ssub.s32 %s942_s14, %s1149_s19  ;;  %p1022_p3 = por %p99_p2, %p98_p1 }
   0xb   : > { %p29_p4 = scmp.ge.s32.totalorder %s1151_s20, 2  ;;  %p105_p6 = scmp.eq.s32.totalorder %s591_s18, 3 }
   0xc   : > { %p594_p7 = scmp.ge.s32.totalorder %s950_s16, 1  ;;  %p141_p9 = scmp.lt.s32.totalorder %s950_s16, 5 }
   0xd   : > { %s1153_s20 = smov (%p29_p4, %s1151_s20), 0  ;;  %p1031_p8 = por %p105_p6, %p104_p5 }
   0xe   : > { %s83_s24 = ssub.s32 %s946_s15, %s1153_s20  ;;  %s88_s25 = sadd.s32 1, %s930_s11 }
   0xf   : > { %s85_s26 = sor.u32 %s84_s21, %s83_s24  ;;  %p142_p10 = pnand %p594_p7, %p141_p9 }
  0x10   : > { %p86_p11 = scmp.eq.s32.totalorder %s85_s26, 0  ;;  %s598_s28 = sshll.u32 (!%p142_p10), %s934_s12, 4 }
  0x11   : > { %145 = sbr.rel (%p142_p10) target bundleno = 333 (0x14d), region = 28  ;;  %s596_s29 = sshll.u32 (!%p142_p10), %s938_s13, 4 }
  0x12   : > { %s1040_s27 = scalar_select %p86_p11, %s930_s11, %s88_s25  }
  0x13   : > { %p175_p12 = scmp.lt.s32.totalorder (!%p142_p10), %s598_s28, 31  ;;  %p169_p13 = scmp.lt.s32.totalorder (!%p142_p10), %s596_s29, 31 }
  0x14   : > { %s165_s18 = sand.u32 (!%p142_p10), 1, %s926_s10   ;;  %s654_s24 = sshll.u32 (!%p142_p10), %s938_s13, 5 }
  0x15   : > { %s595_s21 = sshll.u32 (!%p142_p10), %s165_s18, 6  ;;  %s500_s26 = sadd.s32 (!%p142_p10), %s934_s12, %s654_s24 }
  0x16   : > { %s167_s25 = scalar_lea.vmem (!%p142_p10), [#allocation2], %s595_s21  ;;  %s1084_s3 = scalar_lea.sflag (!%p142_p10), [#allocation3], %s165_s18 }
  0x18   : > { %s1155_s28 = smov (!%p175_p12, %s598_s28), 31  ;;  %s1157_s29 = smov (!%p169_p13, %s596_s29), 31 }
  0x19   : > { %s599_s30 = sshll.u32 %s1155_s28, 2  ;;  %s597_s6 = sshll.u32 %s1157_s29, 2 }
  0x1a   : > { %s1047_s5 = scalar_lea.vmem %s1137_s1, %s599_s30  ;;  %s1054_s17 = scalar_lea.vmem %s1136_s0, %s597_s6 }
  0x1b   : > { %v840_v0 = vld [vmem:[%s1047_s5] sm:$0xff]   ;;  %v841_v1 = vld [vmem:[%s1047_s5 + $0x8] sm:$0xff]   ;;  %v842_v2 = vld [vmem:[%s1047_s5 + $0x10] sm:$0xff]   ;;  %s503_s28 = sshll.u32 %s167_s25, 4  ;;  %s635_s29 = sshll.u32 %s500_s26, 6  ;;  %s1075_s28 = int_to_ptr.vmem [resolvable:$true] %s503_s28 }
  0x1c   : > { %718 = vmatprep.subr.bf16.mxu0 %v840_v0  ;;  %750 = vmatprep.subr.bf16.mxu1 %v840_v0  ;;  %v848_v3 = vld [vmem:[%s1054_s17] sm:$0xff]   ;;  %v843_v5 = vld [vmem:[%s1047_s5 + $0x18] sm:$0xff]   ;;  %v845_v7 = vld [vmem:[%s1047_s5 + $0x28] sm:$0xff]   ;;  %s1080_s30 = scalar_lea.hbm %s1138_s2, %s635_s29  ;;  %s856_s4 = scalar_lea.vmem %s1075_s28, 1024 }
  0x1d   : > { %719 = vmatpush3.bf16.xpose.msra.mxu0 %v840_v0  ;;  %758 = vmatpush3.bf16.xpose.msra.mxu1 %v840_v0  ;;  %v849_v4 = vld [vmem:[%s1054_s17 + $0x20] sm:$0xff]   ;;  %v846_v8 = vld [vmem:[%s1047_s5 + $0x30] sm:$0xff]   ;;  %v847_v9 = vld [vmem:[%s1047_s5 + $0x38] sm:$0xff]   ;;  %p857_p0 = scmp.ne.s32.totalorder %s1075_s28, %s856_s4 }
  0x1e   : > { %720 = vmatprep.subr.bf16.mxu0 %v841_v1  ;;  %751 = vmatprep.subr.bf16.mxu1 %v841_v1  ;;  %v844_v6 = vld [vmem:[%s1047_s5 + $0x20] sm:$0xff]   ;;  %v850_v10 = vld [vmem:[%s1054_s17 + $0x8] sm:$0xff]   ;;  %v852_v12 = vld [vmem:[%s1054_s17 + $0x10] sm:$0xff]   ;;  %s952_s5 = smov [#allocation2]  }
  0x1f   : > { %734 = vmatprep.mubr.bf16.mxu0 %v848_v3  ;;  %742 = vmatprep.mubr.bf16.mxu1 %v849_v4  ;;  %v851_v11 = vld [vmem:[%s1054_s17 + $0x28] sm:$0xff]   ;;  %v853_v13 = vld [vmem:[%s1054_s17 + $0x30] sm:$0xff]   ;;  %v854_v14 = vld [vmem:[%s1054_s17 + $0x18] sm:$0xff]   ;;  %p858_p1 = pnand %p857_p0, %p1022_p3  ;;  %s860_s6 = sshll.u32 %s952_s5, 4  ;;  %s861_s6 = int_to_ptr.vmem [resolvable:$false] %s860_s6 }
  0x20   : > { %v855_v15 = vld [vmem:[%s1054_s17 + $0x38] sm:$0xff]   ;;  %s862_s7 = scalar_lea.vmem %s861_s6, 2048  ;;  %p863_p4 = scmp.lt.s32.totalorder %s1075_s28, %s861_s6 }
  0x21   : > { %p859_p2 = pneg %p858_p1  ;;  %p864_p5 = scmp.lt.s32.totalorder %s862_s7, %s856_s4 }
  0x23   : > { %p865_p6 = por %p864_p5, %p863_p4 }
  0x25   : > { %721 = vmatpush3.bf16.xpose.msra.mxu0 %v841_v1  ;;  %759 = vmatpush3.bf16.xpose.msra.mxu1 %v841_v1  ;;  %p866_p7 = pnand %p865_p6, %p859_p2 }
  0x26   : > { %722 = vmatprep.subr.bf16.mxu0 %v842_v2  ;;  %752 = vmatprep.subr.bf16.mxu1 %v842_v2 }
  0x2d   : > { %723 = vmatpush3.bf16.xpose.msra.mxu0 %v842_v2  ;;  %760 = vmatpush3.bf16.xpose.msra.mxu1 %v842_v2 }
  0x2e   : > { %724 = vmatprep.subr.bf16.mxu0 %v843_v5  ;;  %753 = vmatprep.subr.bf16.mxu1 %v843_v5 }
  0x35   : > { %725 = vmatpush3.bf16.xpose.msra.mxu0 %v843_v5  ;;  %761 = vmatpush3.bf16.xpose.msra.mxu1 %v843_v5 }
  0x36   : > { %726 = vmatprep.subr.bf16.mxu0 %v844_v6  ;;  %754 = vmatprep.subr.bf16.mxu1 %v844_v6 }
  0x3d   : > { %727 = vmatpush3.bf16.xpose.msra.mxu0 %v844_v6  ;;  %762 = vmatpush3.bf16.xpose.msra.mxu1 %v844_v6 }
  0x3e   : > { %728 = vmatprep.subr.bf16.mxu0 %v845_v7  ;;  %755 = vmatprep.subr.bf16.mxu1 %v845_v7 }
  0x45   : > { %729 = vmatpush3.bf16.xpose.msra.mxu0 %v845_v7  ;;  %763 = vmatpush3.bf16.xpose.msra.mxu1 %v845_v7 }
  0x46   : > { %730 = vmatprep.subr.bf16.mxu0 %v846_v8  ;;  %756 = vmatprep.subr.bf16.mxu1 %v846_v8 }
  0x4d   : > { %731 = vmatpush3.bf16.xpose.msra.mxu0 %v846_v8  ;;  %764 = vmatpush3.bf16.xpose.msra.mxu1 %v846_v8 }
  0x4e   : > { %732 = vmatprep.subr.bf16.mxu0 %v847_v9  ;;  %757 = vmatprep.subr.bf16.mxu1 %v847_v9 }
  0x55   : > { %733 = vmatpush3.bf16.xpose.msra.mxu0 %v847_v9  ;;  %765 = vmatpush3.bf16.xpose.msra.mxu1 %v847_v9 }
  0x5c   : > { %735 = vmatmul.mubr.bf16.vlgmr.msra.gmra.mrb[0].mxu0 %v850_v10  ;;  %743 = vmatmul.mubr.bf16.vlgmr.msra.gmra.mrb[0].mxu1 %v851_v11 }
  0x5d   : > { %738 = vmatprep.mubr.bf16.mxu0 %v852_v12  ;;  %746 = vmatprep.mubr.bf16.mxu1 %v853_v13 }
  0x64   : > { %739 = vmatmul.mubr.bf16.gmra.mrb[4].mxu0 %v854_v14  ;;  %747 = vmatmul.mubr.bf16.gmra.mrb[4].mxu1 %v855_v15 }
 0x12f   : > { %v736_v16 = vpop.f32.mrb[0].mxu0  ;;  %v744_v17 = vpop.f32.mrb[0].mxu1 }
 0x130   : > { %v344_v18 = vpop.f32.mrb[1].mxu0  ;;  %v376_v19 = vpop.f32.mrb[1].mxu1 }
 0x131   : > { %v737_v20 = vpop.f32.mrb[2].mxu0  ;;  %v745_v21 = vpop.f32.mrb[2].mxu1 }
 0x132   : > { %v663_v22 = vpack.c.bf16 %v737_v20, %v736_v16  ;;  %v683_v23 = vpack.c.bf16 %v745_v21, %v744_v17  ;;  %v347_v24 = vpop.f32.mrb[3].mxu0  ;;  %v379_v25 = vpop.f32.mrb[3].mxu1 }
 0x133   : > { %v658_v26 = vpack.c.bf16 %v347_v24, %v344_v18  ;;  %v678_v27 = vpack.c.bf16 %v379_v25, %v376_v19 }
 0x134   : > { %695 = vst [vmem:[%s167_s25 + $0x8] sm:$0xff] %v663_v22   ;;  %699 = vst [vmem:[%s167_s25 + $0x28] sm:$0xff] %v683_v23  }
 0x135   : > { %659 = vst [vmem:[%s167_s25] sm:$0xff] %v658_v26   ;;  %698 = vst [vmem:[%s167_s25 + $0x20] sm:$0xff] %v678_v27  }
 0x137   : > { %v740_v28 = vpop.f32.mrb[4].mxu0  ;;  %v748_v29 = vpop.f32.mrb[4].mxu1 }
 0x138   : > { %v360_v30 = vpop.f32.mrb[5].mxu0  ;;  %v392_v31 = vpop.f32.mrb[5].mxu1 }
 0x139   : > { %v741_v32 = vpop.f32.mrb[6].mxu0  ;;  %v749_v33 = vpop.f32.mrb[6].mxu1 }
 0x13a   : > { %v673_v34 = vpack.c.bf16 %v741_v32, %v740_v28  ;;  %v693_v35 = vpack.c.bf16 %v749_v33, %v748_v29  ;;  %v363_v36 = vpop.f32.mrb[7].mxu0  ;;  %v395_v37 = vpop.f32.mrb[7].mxu1 }
 0x13b   : > { %v668_v38 = vpack.c.bf16 %v363_v36, %v360_v30  ;;  %v688_v39 = vpack.c.bf16 %v395_v37, %v392_v31 }
 0x13c   : > { %697 = vst [vmem:[%s167_s25 + $0x18] sm:$0xff] %v673_v34   ;;  %701 = vst [vmem:[%s167_s25 + $0x38] sm:$0xff] %v693_v35  }
 0x13d   : > { %696 = vst [vmem:[%s167_s25 + $0x10] sm:$0xff] %v668_v38   ;;  %700 = vst [vmem:[%s167_s25 + $0x30] sm:$0xff] %v688_v39  }
 0x13e   : > { %869 = shalt.err (!%p866_p7)
}
 0x13f   : > { %s870_s8 = scalar_lea.hbm %s1080_s30, 1024  ;;  %s874_s21 = scalar_lea.hbm %s1138_s2, 4096 }
 0x140   : > { %p871_p9 = scmp.ne.s32.totalorder %s1080_s30, %s870_s8  ;;  %p875_p12 = scmp.lt.u32.totalorder %s1080_s30, %s1138_s2 }
 0x141   : > { %p876_p13 = scmp.lt.u32.totalorder %s874_s21, %s870_s8  ;;  %p878_p1 = scmp.lt.u32.totalorder %s870_s8, %s1080_s30 }
 0x142   : > { %p872_p10 = pnand %p871_p9, %p1022_p3 }
 0x143   : > { %p877_p0 = por %p876_p13, %p875_p12 }
 0x144   : > { %p873_p11 = pneg %p872_p10 }
 0x145   : > { %p879_p2 = por %p878_p1, %p877_p0 }
 0x147   : > { %p880_p4 = pnand %p879_p2, %p873_p11 }
 0x149   : > { %883 = shalt.err (!%p880_p4)
}
 0x14a   : > { %s953_s26 = smov 64   ;;  %s954_s29 = smov 128  }
 0x14b   : > { %s955_s12 = smov 4  }
 0x14c   : > { %766 = dma.vmem_to_hbm [thread:$0]  (%p1022_p3), %s1075_s28, 1024, %s1080_s30, %s1084_s3, %s953_s26, %s954_s29, %s955_s12  }
 0x14d PF: > { %p772_p5 = scmp.ge.s32.totalorder %s950_s16, 2  ;;  %s518_s13 = sand.u32 1, %s922_s9  }
 0x14e   : > { %s519_s4 = scalar_lea.sflag [#allocation3], %s518_s13 }
 0x14f   : > { %p769_p6 = pnand %p772_p5, %p1031_p8 }
 0x151   : > { %917 = dma.done.wait (!%p769_p6), %s519_s4, 1024  }
 0x152   : > { %919 = vsyncadd (!%p769_p6), %s519_s4, 4294966272  ;;  %s15_s16 = sadd.s32 1, %s950_s16   ;;  %s1141_s9 = smov %s926_s10 }
 0x153   : > { %p12_p7 = scmp.ge.s32.totalorder %s15_s16, 6   ;;  %s1142_s10 = smov %s930_s11 }
 0x154   : > { %s1143_s11 = smov %s1040_s27  ;;  %s1144_s12 = smov %s942_s14 }
 0x155   : > { %s1145_s13 = smov %s946_s15  ;;  %s1146_s14 = smov %s1149_s19 }
 0x156   : > { %s1147_s15 = smov %s1153_s20  ;;  %14 = sbr.rel (!%p12_p7) target bundleno = 5 (0x5), region = 66 }
 0x15d   :  { %524 = vsyncpa [#allocation3], 1 }
 0x15e   :  { %526 = vsyncpa [#allocation3 + $0x1], 1 }

// kernel: gcn_model_vae_forward.2
= control target key start
LH: loop header
LB: loop body
LE: loop exit
PB: predicated region body
PF: predicated region fallthrough
CT: control target
= control target key end

     0   :  { %s2319_s18 = smov 0   ;;  %s2621_s0 = inlined_call_operand.vmem [shape: bf16[256,64], index: 0, kind: input, shape index: {}]   ;;  %s2622_s1 = inlined_call_operand.vmem [shape: bf16[256,256], index: 1, kind: input, shape index: {}]   ;;  %s2623_s2 = inlined_call_operand.vmem [shape: bf16[64,128], index: 2, kind: input, shape index: {}]   ;;  %s2624_s3 = inlined_call_operand.vmem [shape: bf16[128,128], index: 3, kind: input, shape index: {}]   ;;  %s2625_s4 = inlined_call_operand.vmem [shape: f32[256,128], index: 4, kind: output, shape index: {0}]   ;;  %s2626_s5 = inlined_call_operand.vmem [shape: bf16[256,128], index: 5, kind: output, shape index: {1}]  }
   0x1 LB: > { %s2325_s19 = sadd.s32 4294967295, %s2287_s18   ;;  %p1666_p0 = scmp.ge.s32.totalorder %s2287_s18, 1  ;;  %s2287_s18 = sphi %s2319_s18, %s16_s18  }
   0x2   : > { %p180_p1 = scmp.lt.s32.totalorder %s2287_s18, 3 }
   0x4   : > { %p181_p2 = pnand %p1666_p0, %p180_p1 }
   0x5   : > { %s1667_s20 = sshll.u32 (!%p181_p2), %s2325_s19, 4  ;;  %p1671_p4 = scmp.ne.s32.totalorder (!%p181_p2), %s2325_s19, 0 }
   0x6   : > { %184 = sbr.rel (%p181_p2) target bundleno = 1149 (0x47d), region = 36  ;;  %p209_p3 = scmp.lt.s32.totalorder (!%p181_p2), %s1667_s20, 31 }
   0xd   : > { %s2628_s20 = smov (!%p209_p3, %s1667_s20), 31  ;;  %224 = sbr.rel (%p1671_p4) target bundleno = 871 (0x367), region = 40 }
   0xe   : > { %s1668_s21 = sshll.u32 %s2628_s20, 3  ;;  %s1670_s22 = sshll.u32 %s2628_s20, 2  ;;  %v2181_v0 = vld [vmem:[%s2623_s2] sm:$0xff] (!%p1671_p4)   ;;  %v2182_v1 = vld [vmem:[%s2623_s2 + $0x8] sm:$0xff] (!%p1671_p4)   ;;  %v2183_v2 = vld [vmem:[%s2623_s2 + $0x10] sm:$0xff] (!%p1671_p4)   ;;  %vm369_vm0 = vcmask (!%p1671_p4), 523264  }
   0xf   : > { %s2333_s25 = scalar_lea.vmem %s2625_s4, %s1668_s21  ;;  %s2338_s28 = scalar_lea.vmem %s2626_s5, %s1670_s22  ;;  %2069 = vmatprep.subr.bf16.mxu0 (!%p1671_p4), %v2181_v0  ;;  %v2185_v3 = vld [vmem:[%s2621_s0] sm:$0xff] (!%p1671_p4)   ;;  %v2184_v4 = vld [vmem:[%s2623_s2 + $0x18] sm:$0xff] (!%p1671_p4)   ;;  %v2186_v5 = vld [vmem:[%s2621_s0 + $0x8] sm:$0xff] (!%p1671_p4)  }
  0x10   : > { %2070 = vmatpush3.bf16.msra.mxu0 (!%p1671_p4), %v2181_v0  ;;  %2077 = vmatprep.mubr.msk.bf16.mxu0 (!%p1671_p4), %vm369_vm0, %v2185_v3  ;;  %v2187_v6 = vld [vmem:[%s2621_s0 + $0x10] sm:$0xff] (!%p1671_p4)   ;;  %v2188_v7 = vld [vmem:[%s2621_s0 + $0x18] sm:$0xff] (!%p1671_p4)   ;;  %v2189_v8 = vld [vmem:[%s2621_s0 + $0x20] sm:$0xff] (!%p1671_p4)  }
  0x11   : > { %2071 = vmatprep.subr.bf16.mxu0 (!%p1671_p4), %v2182_v1  ;;  %v2190_v9 = vld [vmem:[%s2621_s0 + $0x28] sm:$0xff] (!%p1671_p4)   ;;  %v2191_v10 = vld [vmem:[%s2621_s0 + $0x30] sm:$0xff] (!%p1671_p4)   ;;  %v2192_v11 = vld [vmem:[%s2621_s0 + $0x38] sm:$0xff] (!%p1671_p4)  }
  0x12   : > { %v2193_v12 = vld [vmem:[%s2621_s0 + $0x40] sm:$0xff] (!%p1671_p4)   ;;  %v2194_v13 = vld [vmem:[%s2621_s0 + $0x48] sm:$0xff] (!%p1671_p4)   ;;  %v2195_v14 = vld [vmem:[%s2621_s0 + $0x50] sm:$0xff] (!%p1671_p4)  }
  0x13   : > { %v2196_v15 = vld [vmem:[%s2621_s0 + $0x58] sm:$0xff] (!%p1671_p4)   ;;  %v2197_v16 = vld [vmem:[%s2621_s0 + $0x60] sm:$0xff] (!%p1671_p4)   ;;  %v2198_v17 = vld [vmem:[%s2621_s0 + $0x68] sm:$0xff] (!%p1671_p4)  }
  0x14   : > { %2072 = vmatpush3.bf16.msra.mxu0 %v2182_v1  ;;  %v2199_v18 = vld [vmem:[%s2621_s0 + $0x70] sm:$0xff]   ;;  %v2200_v19 = vld [vmem:[%s2621_s0 + $0x78] sm:$0xff]   ;;  %v2203_v20 = vld [vmem:[%s2622_s1 + $0x4] ss:$8 sps:$4 sm:$0xff]  }
  0x15   : > { %2073 = vmatprep.subr.bf16.mxu0 %v2183_v2  ;;  %819 = vmatprep.mubr.bf16.mxu1 %v2203_v20  ;;  %v2219_v20 = vld [vmem:[%s2622_s1 + $0x64] ss:$8 sps:$4 sm:$0xff]  }
  0x18   : > { %2074 = vmatpush3.bf16.msra.mxu0 %v2183_v2 }
  0x19   : > { %2075 = vmatprep.subr.bf16.mxu0 %v2184_v4 }
  0x1c   : > { %2076 = vmatpush3.bf16.msra.mxu0 %v2184_v4 }
  0x1f   : > { %2078 = vmatmul.mubr.msk.bf16.vlgmr.msra.gmra.mrb[0].mxu0 %vm369_vm0, %v2186_v5  ;;  %v2249_v5 = vld [vmem:[%s2624_s3] sm:$0xff]  }
  0x20   : > { %2081 = vmatprep.mubr.msk.bf16.mxu0 %vm369_vm0, %v2187_v6  ;;  %v2250_v6 = vld [vmem:[%s2624_s3 + $0x8] sm:$0xff]   ;;  %2109 = vmatprep.subr.bf16.mxu0 %v2249_v5 }
  0x21   : > { %2110 = vmatpush3.bf16.msra.mxu0 %v2249_v5 }
  0x22   : > { %2111 = vmatprep.subr.bf16.mxu0 %v2250_v6 }
  0x25   : > { %2112 = vmatpush3.bf16.msra.mxu0 %v2250_v6 }
  0x27   : > { %2082 = vmatmul.mubr.msk.bf16.gmra.mrb[4].mxu0 %vm369_vm0, %v2188_v7  ;;  %v2201_v7 = vld [vmem:[%s2622_s1] ss:$8 sps:$4 sm:$0xff]  }
  0x28   : > { %2085 = vmatprep.mubr.msk.bf16.mxu0 %vm369_vm0, %v2189_v8  ;;  %v2251_v8 = vld [vmem:[%s2624_s3 + $0x10] sm:$0xff]  }
  0x29   : > { %2113 = vmatprep.subr.bf16.mxu0 %v2251_v8 }
  0x2a   : > { %2114 = vmatpush3.bf16.msra.mxu0 %v2251_v8 }
  0x2f   : > { %2086 = vmatmul.mubr.msk.bf16.gmra.mrb[8].mxu0 %vm369_vm0, %v2190_v9  ;;  %v2204_v9 = vld [vmem:[%s2622_s1 + $0x14] ss:$8 sps:$4 sm:$0xff]  }
  0x30   : > { %2089 = vmatprep.mubr.msk.bf16.mxu0 %vm369_vm0, %v2191_v10  ;;  %v2252_v10 = vld [vmem:[%s2624_s3 + $0x18] sm:$0xff]  }
  0x31   : > { %2115 = vmatprep.subr.bf16.mxu0 %v2252_v10 }
  0x32   : > { %2116 = vmatpush3.bf16.msra.mxu0 %v2252_v10 }
  0x37   : > { %2090 = vmatmul.mubr.msk.bf16.gmra.mrb[12].mxu0 %vm369_vm0, %v2192_v11  ;;  %v2206_v11 = vld [vmem:[%s2622_s1 + $0x10] ss:$8 sps:$4 sm:$0xff]  }
  0x38   : > { %2093 = vmatprep.mubr.msk.bf16.mxu0 %vm369_vm0, %v2193_v12  ;;  %v2207_v12 = vld [vmem:[%s2622_s1 + $0x24] ss:$8 sps:$4 sm:$0xff]  }
  0x3f   : > { %2094 = vmatmul.mubr.msk.bf16.gmra.mrb[16].mxu0 %vm369_vm0, %v2194_v13  ;;  %v2209_v13 = vld [vmem:[%s2622_s1 + $0x20] ss:$8 sps:$4 sm:$0xff]  }
  0x40   : > { %2097 = vmatprep.mubr.msk.bf16.mxu0 %vm369_vm0, %v2195_v14  ;;  %v2210_v14 = vld [vmem:[%s2622_s1 + $0x34] ss:$8 sps:$4 sm:$0xff]  }
  0x47   : > { %2098 = vmatmul.mubr.msk.bf16.gmra.mrb[20].mxu0 %vm369_vm0, %v2196_v15  ;;  %v2212_v15 = vld [vmem:[%s2622_s1 + $0x30] ss:$8 sps:$4 sm:$0xff]  }
  0x48   : > { %2101 = vmatprep.mubr.msk.bf16.mxu0 %vm369_vm0, %v2197_v16  ;;  %v2213_v16 = vld [vmem:[%s2622_s1 + $0x44] ss:$8 sps:$4 sm:$0xff]  }
  0x4f   : > { %2102 = vmatmul.mubr.msk.bf16.gmra.mrb[24].mxu0 %vm369_vm0, %v2198_v17  ;;  %v2215_v17 = vld [vmem:[%s2622_s1 + $0x40] ss:$8 sps:$4 sm:$0xff]  }
  0x50   : > { %2105 = vmatprep.mubr.msk.bf16.mxu0 %vm369_vm0, %v2199_v18  ;;  %v2216_v18 = vld [vmem:[%s2622_s1 + $0x54] ss:$8 sps:$4 sm:$0xff]  }
  0x57   : > { %2106 = vmatmul.mubr.msk.bf16.gmra.mrb[28].mxu0 %vm369_vm0, %v2200_v19  ;;  %v2218_v19 = vld [vmem:[%s2622_s1 + $0x50] ss:$8 sps:$4 sm:$0xff]  }
  0xf2   : > { %v2079_v21 = vpop.f32.mrb[0].mxu0 }
  0xf3   : > { %v452_v22 = vpop.f32.mrb[1].mxu0 }
  0xf4   : > { %v2080_v23 = vpop.f32.mrb[2].mxu0 }
  0xf5   : > { %v612_v24 = vpack.c.bf16 %v2080_v23, %v2079_v21  ;;  %v455_v25 = vpop.f32.mrb[3].mxu0  ;;  %v2221_v21 = vld [vmem:[%s2622_s1 + $0x60] ss:$8 sps:$4 sm:$0xff]   ;;  %v2224_v23 = vld [vmem:[%s2622_s1 + $0x70] ss:$8 sps:$4 sm:$0xff]  }
  0xf6   : > { %v611_v26 = vpack.c.bf16 %v455_v25, %v452_v22  ;;  %v2222_v22 = vld [vmem:[%s2622_s1 + $0x74] ss:$8 sps:$4 sm:$0xff]   ;;  %v2227_v25 = vld [vmem:[%s2622_s1 + $0x80] ss:$8 sps:$4 sm:$0xff]  }
  0xfa   : > { %v2083_v27 = vpop.f32.mrb[4].mxu0 }
  0xfb   : > { %v468_v28 = vpop.f32.mrb[5].mxu0 }
  0xfc   : > { %v2084_v29 = vpop.f32.mrb[6].mxu0 }
  0xfd   : > { %v614_v30 = vpack.c.bf16 %v2084_v29, %v2083_v27  ;;  %v471_v31 = vpop.f32.mrb[7].mxu0  ;;  %v2230_v27 = vld [vmem:[%s2622_s1 + $0x90] ss:$8 sps:$4 sm:$0xff]   ;;  %v2233_v29 = vld [vmem:[%s2622_s1 + $0xa0] ss:$8 sps:$4 sm:$0xff]  }
  0xfe   : > { %v613_v32 = vpack.c.bf16 %v471_v31, %v468_v28  ;;  %v2231_v28 = vld [vmem:[%s2622_s1 + $0xa4] ss:$8 sps:$4 sm:$0xff]  }
  0xff   : > { %v2253_v31 = vld [vmem:[%s2624_s3 + $0x20] sm:$0xff]  }
 0x100   : > { %2117 = vmatprep.subr.bf16.mxu0 %v2253_v31 }
 0x101   : > { %2118 = vmatpush3.bf16.msra.mxu0 %v2253_v31 }
 0x102   : > { %v2087_v33 = vpop.f32.mrb[8].mxu0 }
 0x103   : > { %v484_v34 = vpop.f32.mrb[9].mxu0 }
 0x104   : > { %v2088_v35 = vpop.f32.mrb[10].mxu0 }
 0x105   : > { %v616_v36 = vpack.c.bf16 %v2088_v35, %v2087_v33  ;;  %v487_v37 = vpop.f32.mrb[11].mxu0  ;;  %v2237_v33 = vld [vmem:[%s2622_s1 + $0xc4] ss:$8 sps:$4 sm:$0xff]   ;;  %v2255_v35 = vld [vmem:[%s2624_s3 + $0x30] sm:$0xff]  }
 0x106   : > { %v615_v38 = vpack.c.bf16 %v487_v37, %v484_v34  ;;  %v2254_v34 = vld [vmem:[%s2624_s3 + $0x28] sm:$0xff]   ;;  %v2240_v37 = vld [vmem:[%s2622_s1 + $0xd4] ss:$8 sps:$4 sm:$0xff]  }
 0x107   : > { %2119 = vmatprep.subr.bf16.mxu0 %v2254_v34 }
 0x108   : > { %2120 = vmatpush3.bf16.msra.mxu0 %v2254_v34 }
 0x109   : > { %2121 = vmatprep.subr.bf16.mxu0 %v2255_v35 }
 0x10a   : > { %v2091_v39 = vpop.f32.mrb[12].mxu0 }
 0x10b   : > { %v500_v40 = vpop.f32.mrb[13].mxu0 }
 0x10c   : > { %v2092_v41 = vpop.f32.mrb[14].mxu0  ;;  %2122 = vmatpush3.bf16.msra.mxu0 %v2255_v35 }
 0x10d   : > { %v618_v42 = vpack.c.bf16 %v2092_v41, %v2091_v39  ;;  %v503_v43 = vpop.f32.mrb[15].mxu0  ;;  %v2242_v39 = vld [vmem:[%s2622_s1 + $0xd0] ss:$8 sps:$4 sm:$0xff]   ;;  %v2245_v41 = vld [vmem:[%s2622_s1 + $0xe0] ss:$8 sps:$4 sm:$0xff]  }
 0x10e   : > { %v617_v44 = vpack.c.bf16 %v503_v43, %v500_v40  ;;  %v2243_v40 = vld [vmem:[%s2622_s1 + $0xe4] ss:$8 sps:$4 sm:$0xff]   ;;  %v2248_v43 = vld [vmem:[%s2622_s1 + $0xf0] ss:$8 sps:$4 sm:$0xff]  }
 0x112   : > { %v2095_v45 = vpop.f32.mrb[16].mxu0 }
 0x113   : > { %v516_v46 = vpop.f32.mrb[17].mxu0 }
 0x114   : > { %v2096_v47 = vpop.f32.mrb[18].mxu0 }
 0x115   : > { %v620_v48 = vpack.c.bf16 %v2096_v47, %v2095_v45  ;;  %v519_v49 = vpop.f32.mrb[19].mxu0 }
 0x116   : > { %v619_v50 = vpack.c.bf16 %v519_v49, %v516_v46 }
 0x118   : > { %1869 = vmatprep.subr.bf16.mxu1 %v619_v50 }
 0x119   : > { %1870 = vmatpush3.bf16.msra.mxu1 %v611_v26  ;;  %v2228_v26 = vld [vmem:[%s2622_s1 + $0x94] ss:$8 sps:$4 sm:$0xff]  }
 0x11a   : > { %v2099_v51 = vpop.f32.mrb[20].mxu0  ;;  %1871 = vmatprep.subr.bf16.mxu1 %v620_v48 }
 0x11b   : > { %v532_v52 = vpop.f32.mrb[21].mxu0 }
 0x11c   : > { %v2100_v53 = vpop.f32.mrb[22].mxu0 }
 0x11d   : > { %v622_v54 = vpack.c.bf16 %v2100_v53, %v2099_v51  ;;  %v535_v55 = vpop.f32.mrb[23].mxu0  ;;  %1872 = vmatpush3.bf16.msra.mxu1 %v612_v24  ;;  %v2225_v24 = vld [vmem:[%s2622_s1 + $0x84] ss:$8 sps:$4 sm:$0xff]  }
 0x11e   : > { %v621_v56 = vpack.c.bf16 %v535_v55, %v532_v52 }
 0x120   : > { %1873 = vmatprep.subr.bf16.mxu1 %v621_v56 }
 0x121   : > { %1874 = vmatpush3.bf16.msra.mxu1 %v613_v32  ;;  %v2236_v32 = vld [vmem:[%s2622_s1 + $0xb0] ss:$8 sps:$4 sm:$0xff]  }
 0x122   : > { %v2103_v57 = vpop.f32.mrb[24].mxu0  ;;  %1875 = vmatprep.subr.bf16.mxu1 %v622_v54 }
 0x123   : > { %v548_v58 = vpop.f32.mrb[25].mxu0 }
 0x124   : > { %v2104_v59 = vpop.f32.mrb[26].mxu0 }
 0x125   : > { %v624_v60 = vpack.c.bf16 %v2104_v59, %v2103_v57  ;;  %v551_v61 = vpop.f32.mrb[27].mxu0  ;;  %1876 = vmatpush3.bf16.msra.mxu1 %v614_v30  ;;  %v2234_v30 = vld [vmem:[%s2622_s1 + $0xb4] ss:$8 sps:$4 sm:$0xff]  }
 0x126   : > { %v623_v62 = vpack.c.bf16 %v551_v61, %v548_v58 }
 0x128   : > { %1877 = vmatprep.subr.bf16.mxu1 %v623_v62 }
 0x129   : > { %1878 = vmatpush3.bf16.msra.mxu1 %v615_v38  ;;  %v2256_v38 = vld [vmem:[%s2624_s3 + $0x38] sm:$0xff]  }
 0x12a   : > { %v2107_v63 = vpop.f32.mrb[28].mxu0  ;;  %1879 = vmatprep.subr.bf16.mxu1 %v624_v60  ;;  %2123 = vmatprep.subr.bf16.mxu0 %v2256_v38 }
 0x12b   : > { %v564_v0 = vpop.f32.mrb[29].mxu0  ;;  %2124 = vmatpush3.bf16.msra.mxu0 %v2256_v38 }
 0x12c   : > { %v2108_v1 = vpop.f32.mrb[30].mxu0 }
 0x12d   : > { %v626_v2 = vpack.c.bf16 %v2108_v1, %v2107_v63  ;;  %v567_v3 = vpop.f32.mrb[31].mxu0  ;;  %1880 = vmatpush3.bf16.msra.mxu1 %v616_v36  ;;  %v2239_v36 = vld [vmem:[%s2622_s1 + $0xc0] ss:$8 sps:$4 sm:$0xff]  }
 0x12e   : > { %v625_v4 = vpack.c.bf16 %v567_v3, %v564_v0 }
 0x130   : > { %1881 = vmatprep.subr.bf16.mxu1 %v625_v4 }
 0x131   : > { %1882 = vmatpush3.bf16.msra.mxu1 %v617_v44 }
 0x132   : > { %1883 = vmatprep.subr.bf16.mxu1 %v626_v2 }
 0x135   : > { %1884 = vmatpush3.bf16.msra.mxu1 %v618_v42  ;;  %v2246_v42 = vld [vmem:[%s2622_s1 + $0xf4] ss:$8 sps:$4 sm:$0xff]  }
 0x138   : > { %820 = vmatmul.mubr.bf16.vlgmr.msra.gmra.mrb[0].mxu1 %v2201_v7 }
 0x139   : > { %827 = vmatprep.mubr.bf16.mxu1 %v2204_v9 }
 0x140   : > { %828 = vmatmul.mubr.bf16.gmra.mrb[4].mxu1 %v2206_v11 }
 0x141   : > { %835 = vmatprep.mubr.bf16.mxu1 %v2207_v12 }
 0x148   : > { %836 = vmatmul.mubr.bf16.gmra.mrb[8].mxu1 %v2209_v13 }
 0x149   : > { %843 = vmatprep.mubr.bf16.mxu1 %v2210_v14 }
 0x150   : > { %844 = vmatmul.mubr.bf16.gmra.mrb[12].mxu1 %v2212_v15 }
 0x151   : > { %851 = vmatprep.mubr.bf16.mxu1 %v2213_v16 }
 0x158   : > { %852 = vmatmul.mubr.bf16.gmra.mrb[16].mxu1 %v2215_v17 }
 0x159   : > { %859 = vmatprep.mubr.bf16.mxu1 %v2216_v18 }
 0x160   : > { %860 = vmatmul.mubr.bf16.gmra.mrb[20].mxu1 %v2218_v19 }
 0x161   : > { %867 = vmatprep.mubr.bf16.mxu1 %v2219_v20 }
 0x168   : > { %868 = vmatmul.mubr.bf16.gmra.mrb[24].mxu1 %v2221_v21 }
 0x169   : > { %875 = vmatprep.mubr.bf16.mxu1 %v2222_v22 }
 0x170   : > { %876 = vmatmul.mubr.bf16.gmra.mrb[28].mxu1 %v2224_v23 }
 0x171   : > { %883 = vmatprep.mubr.bf16.mxu1 %v2225_v24 }
 0x178   : > { %884 = vmatmul.mubr.bf16.gmra.mrb[32].mxu1 %v2227_v25 }
 0x179   : > { %891 = vmatprep.mubr.bf16.mxu1 %v2228_v26 }
 0x180   : > { %892 = vmatmul.mubr.bf16.gmra.mrb[36].mxu1 %v2230_v27 }
 0x181   : > { %899 = vmatprep.mubr.bf16.mxu1 %v2231_v28 }
 0x188   : > { %900 = vmatmul.mubr.bf16.gmra.mrb[40].mxu1 %v2233_v29 }
 0x189   : > { %907 = vmatprep.mubr.bf16.mxu1 %v2234_v30 }
 0x190   : > { %908 = vmatmul.mubr.bf16.gmra.mrb[44].mxu1 %v2236_v32 }
 0x191   : > { %915 = vmatprep.mubr.bf16.mxu1 %v2237_v33 }
 0x198   : > { %916 = vmatmul.mubr.bf16.gmra.mrb[48].mxu1 %v2239_v36 }
 0x199   : > { %923 = vmatprep.mubr.bf16.mxu1 %v2240_v37 }
 0x1a0   : > { %924 = vmatmul.mubr.bf16.gmra.mrb[52].mxu1 %v2242_v39 }
 0x1a1   : > { %931 = vmatprep.mubr.bf16.mxu1 %v2243_v40 }
 0x1a8   : > { %932 = vmatmul.mubr.bf16.gmra.mrb[56].mxu1 %v2245_v41 }
 0x1a9   : > { %939 = vmatprep.mubr.bf16.mxu1 %v2246_v42 }
 0x1b0   : > { %940 = vmatmul.mubr.bf16.gmra.mrb[60].mxu1 %v2248_v43 }
 0x20b   : > { %v1885_v44 = vpop.f32.mrb[0].mxu1 }
 0x20c   : > { %v1886_v45 = vpop.f32.mrb[1].mxu1 }
 0x20d   : > { %v1887_v46 = vadd.f32 %v1886_v45, %v1885_v44  ;;  %v1888_v47 = vpop.f32.mrb[2].mxu1 }
 0x20e   : > { %v1889_v48 = vpop.f32.mrb[3].mxu1 }
 0x20f   : > { %v1890_v49 = vadd.f32 %v1889_v48, %v1888_v47  ;;  %v948_v50 = vmax.f32 %v1887_v46, 0.0 }
 0x211   : > { %v949_v51 = vmax.f32 %v1890_v49, 0.0 }
 0x213   : > { %v980_v52 = vpack.c.bf16 %v949_v51, %v948_v50  ;;  %v1891_v53 = vpop.f32.mrb[4].mxu1 }
 0x214   : > { %v1892_v54 = vpop.f32.mrb[5].mxu1 }
 0x215   : > { %v1893_v55 = vadd.f32 %v1892_v54, %v1891_v53  ;;  %v1894_v56 = vpop.f32.mrb[6].mxu1  ;;  %2125 = vmatprep.mubr.bf16.mxu0 %v980_v52 }
 0x216   : > { %v1895_v57 = vpop.f32.mrb[7].mxu1 }
 0x217   : > { %v1896_v58 = vadd.f32 %v1895_v57, %v1894_v56  ;;  %v950_v59 = vmax.f32 %v1893_v55, 0.0 }
 0x219   : > { %v951_v60 = vmax.f32 %v1896_v58, 0.0 }
 0x21b   : > { %v981_v61 = vpack.c.bf16 %v951_v60, %v950_v59  ;;  %v1897_v62 = vpop.f32.mrb[8].mxu1 }
 0x21c   : > { %v1898_v63 = vpop.f32.mrb[9].mxu1 }
 0x21d   : > { %v1899_v0 = vadd.f32 %v1898_v63, %v1897_v62  ;;  %v1900_v1 = vpop.f32.mrb[10].mxu1  ;;  %2126 = vmatmul.mubr.bf16.vlgmr.msra.gmra.mrb[32].mxu0 %v981_v61 }
 0x21e   : > { %v1901_v2 = vpop.f32.mrb[11].mxu1 }
 0x21f   : > { %v1902_v3 = vadd.f32 %v1901_v2, %v1900_v1  ;;  %v952_v4 = vmax.f32 %v1899_v0, 0.0 }
 0x221   : > { %v953_v5 = vmax.f32 %v1902_v3, 0.0 }
 0x223   : > { %v982_v6 = vpack.c.bf16 %v953_v5, %v952_v4  ;;  %v1903_v7 = vpop.f32.mrb[12].mxu1 }
 0x224   : > { %v1904_v8 = vpop.f32.mrb[13].mxu1 }
 0x225   : > { %v1905_v9 = vadd.f32 %v1904_v8, %v1903_v7  ;;  %v1906_v10 = vpop.f32.mrb[14].mxu1  ;;  %2129 = vmatprep.mubr.bf16.mxu0 %v982_v6 }
 0x226   : > { %v1907_v11 = vpop.f32.mrb[15].mxu1 }
 0x227   : > { %v1908_v12 = vadd.f32 %v1907_v11, %v1906_v10  ;;  %v954_v13 = vmax.f32 %v1905_v9, 0.0 }
 0x229   : > { %v955_v14 = vmax.f32 %v1908_v12, 0.0 }
 0x22b   : > { %v983_v15 = vpack.c.bf16 %v955_v14, %v954_v13  ;;  %v1909_v16 = vpop.f32.mrb[16].mxu1 }
 0x22c   : > { %v1910_v17 = vpop.f32.mrb[17].mxu1 }
 0x22d   : > { %v1911_v18 = vadd.f32 %v1910_v17, %v1909_v16  ;;  %v1912_v19 = vpop.f32.mrb[18].mxu1  ;;  %2130 = vmatmul.mubr.bf16.gmra.mrb[36].mxu0 %v983_v15 }
 0x22e   : > { %v1913_v20 = vpop.f32.mrb[19].mxu1 }
 0x22f   : > { %v1914_v21 = vadd.f32 %v1913_v20, %v1912_v19  ;;  %v956_v22 = vmax.f32 %v1911_v18, 0.0 }
 0x231   : > { %v957_v23 = vmax.f32 %v1914_v21, 0.0 }
 0x233   : > { %v984_v24 = vpack.c.bf16 %v957_v23, %v956_v22  ;;  %v1915_v25 = vpop.f32.mrb[20].mxu1 }
 0x234   : > { %v1916_v26 = vpop.f32.mrb[21].mxu1 }
 0x235   : > { %v1917_v27 = vadd.f32 %v1916_v26, %v1915_v25  ;;  %v1918_v28 = vpop.f32.mrb[22].mxu1  ;;  %2133 = vmatprep.mubr.bf16.mxu0 %v984_v24 }
 0x236   : > { %v1919_v29 = vpop.f32.mrb[23].mxu1 }
 0x237   : > { %v1920_v30 = vadd.f32 %v1919_v29, %v1918_v28  ;;  %v958_v31 = vmax.f32 %v1917_v27, 0.0 }
 0x239   : > { %v959_v32 = vmax.f32 %v1920_v30, 0.0 }
 0x23b   : > { %v985_v33 = vpack.c.bf16 %v959_v32, %v958_v31  ;;  %v1921_v34 = vpop.f32.mrb[24].mxu1 }
 0x23c   : > { %v1922_v35 = vpop.f32.mrb[25].mxu1 }
 0x23d   : > { %v1923_v36 = vadd.f32 %v1922_v35, %v1921_v34  ;;  %v1924_v37 = vpop.f32.mrb[26].mxu1  ;;  %2134 = vmatmul.mubr.bf16.gmra.mrb[40].mxu0 %v985_v33 }
 0x23e   : > { %v1925_v38 = vpop.f32.mrb[27].mxu1 }
 0x23f   : > { %v1926_v39 = vadd.f32 %v1925_v38, %v1924_v37  ;;  %v960_v40 = vmax.f32 %v1923_v36, 0.0 }
 0x241   : > { %v961_v41 = vmax.f32 %v1926_v39, 0.0 }
 0x243   : > { %v986_v42 = vpack.c.bf16 %v961_v41, %v960_v40  ;;  %v1927_v43 = vpop.f32.mrb[28].mxu1 }
 0x244   : > { %v1928_v44 = vpop.f32.mrb[29].mxu1 }
 0x245   : > { %v1929_v45 = vadd.f32 %v1928_v44, %v1927_v43  ;;  %v1930_v46 = vpop.f32.mrb[30].mxu1  ;;  %2137 = vmatprep.mubr.bf16.mxu0 %v986_v42 }
 0x246   : > { %v1931_v47 = vpop.f32.mrb[31].mxu1 }
 0x247   : > { %v1932_v48 = vadd.f32 %v1931_v47, %v1930_v46  ;;  %v962_v49 = vmax.f32 %v1929_v45, 0.0 }
 0x249   : > { %v963_v50 = vmax.f32 %v1932_v48, 0.0 }
 0x24b   : > { %v987_v51 = vpack.c.bf16 %v963_v50, %v962_v49  ;;  %v1933_v52 = vpop.f32.mrb[32].mxu1 }
 0x24c   : > { %v1934_v53 = vpop.f32.mrb[33].mxu1 }
 0x24d   : > { %v1935_v54 = vadd.f32 %v1934_v53, %v1933_v52  ;;  %v1936_v55 = vpop.f32.mrb[34].mxu1  ;;  %2138 = vmatmul.mubr.bf16.gmra.mrb[44].mxu0 %v987_v51 }
 0x24e   : > { %v1937_v56 = vpop.f32.mrb[35].mxu1 }
 0x24f   : > { %v1938_v57 = vadd.f32 %v1937_v56, %v1936_v55  ;;  %v964_v58 = vmax.f32 %v1935_v54, 0.0 }
 0x251   : > { %v965_v59 = vmax.f32 %v1938_v57, 0.0 }
 0x253   : > { %v988_v60 = vpack.c.bf16 %v965_v59, %v964_v58  ;;  %v1939_v61 = vpop.f32.mrb[36].mxu1 }
 0x254   : > { %v1940_v62 = vpop.f32.mrb[37].mxu1 }
 0x255   : > { %v1941_v63 = vadd.f32 %v1940_v62, %v1939_v61  ;;  %v1942_v0 = vpop.f32.mrb[38].mxu1  ;;  %2141 = vmatprep.mubr.bf16.mxu0 %v988_v60 }
 0x256   : > { %v1943_v1 = vpop.f32.mrb[39].mxu1 }
 0x257   : > { %v1944_v2 = vadd.f32 %v1943_v1, %v1942_v0  ;;  %v966_v3 = vmax.f32 %v1941_v63, 0.0 }
 0x259   : > { %v967_v4 = vmax.f32 %v1944_v2, 0.0 }
 0x25b   : > { %v989_v5 = vpack.c.bf16 %v967_v4, %v966_v3  ;;  %v1945_v6 = vpop.f32.mrb[40].mxu1 }
 0x25c   : > { %v1946_v7 = vpop.f32.mrb[41].mxu1 }
 0x25d   : > { %v1947_v8 = vadd.f32 %v1946_v7, %v1945_v6  ;;  %v1948_v9 = vpop.f32.mrb[42].mxu1  ;;  %2142 = vmatmul.mubr.bf16.gmra.mrb[48].mxu0 %v989_v5 }
 0x25e   : > { %v1949_v10 = vpop.f32.mrb[43].mxu1 }
 0x25f   : > { %v1950_v11 = vadd.f32 %v1949_v10, %v1948_v9  ;;  %v968_v12 = vmax.f32 %v1947_v8, 0.0 }
 0x261   : > { %v969_v13 = vmax.f32 %v1950_v11, 0.0 }
 0x263   : > { %v990_v14 = vpack.c.bf16 %v969_v13, %v968_v12  ;;  %v1951_v15 = vpop.f32.mrb[44].mxu1 }
 0x264   : > { %v1952_v16 = vpop.f32.mrb[45].mxu1 }
 0x265   : > { %v1953_v17 = vadd.f32 %v1952_v16, %v1951_v15  ;;  %v1954_v18 = vpop.f32.mrb[46].mxu1  ;;  %2145 = vmatprep.mubr.bf16.mxu0 %v990_v14 }
 0x266   : > { %v1955_v19 = vpop.f32.mrb[47].mxu1 }
 0x267   : > { %v1956_v20 = vadd.f32 %v1955_v19, %v1954_v18  ;;  %v970_v21 = vmax.f32 %v1953_v17, 0.0 }
 0x269   : > { %v971_v22 = vmax.f32 %v1956_v20, 0.0 }
 0x26b   : > { %v991_v23 = vpack.c.bf16 %v971_v22, %v970_v21  ;;  %v1957_v24 = vpop.f32.mrb[48].mxu1 }
 0x26c   : > { %v1958_v25 = vpop.f32.mrb[49].mxu1 }
 0x26d   : > { %v1959_v26 = vadd.f32 %v1958_v25, %v1957_v24  ;;  %v1960_v27 = vpop.f32.mrb[50].mxu1  ;;  %2146 = vmatmul.mubr.bf16.gmra.mrb[52].mxu0 %v991_v23 }
 0x26e   : > { %v1961_v28 = vpop.f32.mrb[51].mxu1 }
 0x26f   : > { %v1962_v29 = vadd.f32 %v1961_v28, %v1960_v27  ;;  %v972_v30 = vmax.f32 %v1959_v26, 0.0 }
 0x271   : > { %v973_v31 = vmax.f32 %v1962_v29, 0.0 }
 0x273   : > { %v992_v32 = vpack.c.bf16 %v973_v31, %v972_v30  ;;  %v1963_v33 = vpop.f32.mrb[52].mxu1 }
 0x274   : > { %v1964_v34 = vpop.f32.mrb[53].mxu1 }
 0x275   : > { %v1965_v35 = vadd.f32 %v1964_v34, %v1963_v33  ;;  %v1966_v36 = vpop.f32.mrb[54].mxu1  ;;  %2149 = vmatprep.mubr.bf16.mxu0 %v992_v32 }
 0x276   : > { %v1967_v37 = vpop.f32.mrb[55].mxu1 }
 0x277   : > { %v1968_v38 = vadd.f32 %v1967_v37, %v1966_v36  ;;  %v974_v39 = vmax.f32 %v1965_v35, 0.0 }
 0x279   : > { %v975_v40 = vmax.f32 %v1968_v38, 0.0 }
 0x27b   : > { %v993_v41 = vpack.c.bf16 %v975_v40, %v974_v39  ;;  %v1969_v42 = vpop.f32.mrb[56].mxu1 }
 0x27c   : > { %v1970_v43 = vpop.f32.mrb[57].mxu1 }
 0x27d   : > { %v1971_v44 = vadd.f32 %v1970_v43, %v1969_v42  ;;  %v1972_v45 = vpop.f32.mrb[58].mxu1  ;;  %2150 = vmatmul.mubr.bf16.gmra.mrb[56].mxu0 %v993_v41 }
 0x27e   : > { %v1973_v46 = vpop.f32.mrb[59].mxu1 }
 0x27f   : > { %v1974_v47 = vadd.f32 %v1973_v46, %v1972_v45  ;;  %v976_v48 = vmax.f32 %v1971_v44, 0.0 }
 0x281   : > { %v977_v49 = vmax.f32 %v1974_v47, 0.0 }
 0x283   : > { %v994_v50 = vpack.c.bf16 %v977_v49, %v976_v48  ;;  %v1975_v51 = vpop.f32.mrb[60].mxu1 }
 0x284   : > { %v1976_v52 = vpop.f32.mrb[61].mxu1 }
 0x285   : > { %v1977_v53 = vadd.f32 %v1976_v52, %v1975_v51  ;;  %v1978_v54 = vpop.f32.mrb[62].mxu1  ;;  %2153 = vmatprep.mubr.bf16.mxu0 %v994_v50 }
 0x286   : > { %v1979_v55 = vpop.f32.mrb[63].mxu1 }
 0x287   : > { %v1980_v56 = vadd.f32 %v1979_v55, %v1978_v54  ;;  %v978_v57 = vmax.f32 %v1977_v53, 0.0 }
 0x289   : > { %v979_v58 = vmax.f32 %v1980_v56, 0.0 }
 0x28b   : > { %v995_v59 = vpack.c.bf16 %v979_v58, %v978_v57 }
 0x28d   : > { %2154 = vmatmul.mubr.bf16.gmra.mrb[60].mxu0 %v995_v59 }
 0x2f0   : > { %v2127_v60 = vpop.f32.mrb[32].mxu0 }
 0x2f1   : > { %v1094_v61 = vpop.f32.mrb[33].mxu0 }
 0x2f2   : > { %v2128_v62 = vpop.f32.mrb[34].mxu0 }
 0x2f3   : > { %v1222_v63 = vpack.c.bf16 %v2128_v62, %v2127_v60  ;;  %v1097_v0 = vpop.f32.mrb[35].mxu0 }
 0x2f4   : > { %v1221_v1 = vpack.c.bf16 %v1097_v0, %v1094_v61 }
 0x2f5   : > { %1238 = vst [vmem:[#allocation2 + $0x8] sm:$0xff] %v1222_v63 }
 0x2f6   : > { %1237 = vst [vmem:[#allocation2] sm:$0xff] %v1221_v1 }
 0x300   : > { %v2131_v2 = vpop.f32.mrb[36].mxu0 }
 0x301   : > { %v1110_v3 = vpop.f32.mrb[37].mxu0 }
 0x302   : > { %v2132_v4 = vpop.f32.mrb[38].mxu0 }
 0x303   : > { %v1224_v5 = vpack.c.bf16 %v2132_v4, %v2131_v2  ;;  %v1113_v6 = vpop.f32.mrb[39].mxu0 }
 0x304   : > { %v1223_v7 = vpack.c.bf16 %v1113_v6, %v1110_v3 }
 0x305   : > { %1240 = vst [vmem:[#allocation2 + $0x18] sm:$0xff] %v1224_v5 }
 0x306   : > { %1239 = vst [vmem:[#allocation2 + $0x10] sm:$0xff] %v1223_v7 }
 0x310   : > { %v2135_v8 = vpop.f32.mrb[40].mxu0 }
 0x311   : > { %v1126_v9 = vpop.f32.mrb[41].mxu0 }
 0x312   : > { %v2136_v10 = vpop.f32.mrb[42].mxu0 }
 0x313   : > { %v1226_v11 = vpack.c.bf16 %v2136_v10, %v2135_v8  ;;  %v1129_v12 = vpop.f32.mrb[43].mxu0 }
 0x314   : > { %v1225_v13 = vpack.c.bf16 %v1129_v12, %v1126_v9 }
 0x315   : > { %1242 = vst [vmem:[#allocation2 + $0x28] sm:$0xff] %v1226_v11 }
 0x316   : > { %1241 = vst [vmem:[#allocation2 + $0x20] sm:$0xff] %v1225_v13 }
 0x320   : > { %v2139_v14 = vpop.f32.mrb[44].mxu0 }
 0x321   : > { %v1142_v15 = vpop.f32.mrb[45].mxu0 }
 0x322   : > { %v2140_v16 = vpop.f32.mrb[46].mxu0 }
 0x323   : > { %v1228_v17 = vpack.c.bf16 %v2140_v16, %v2139_v14  ;;  %v1145_v18 = vpop.f32.mrb[47].mxu0 }
 0x324   : > { %v1227_v19 = vpack.c.bf16 %v1145_v18, %v1142_v15 }
 0x325   : > { %1244 = vst [vmem:[#allocation2 + $0x38] sm:$0xff] %v1228_v17 }
 0x326   : > { %1243 = vst [vmem:[#allocation2 + $0x30] sm:$0xff] %v1227_v19 }
 0x330   : > { %v2143_v20 = vpop.f32.mrb[48].mxu0 }
 0x331   : > { %v1158_v21 = vpop.f32.mrb[49].mxu0 }
 0x332   : > { %v2144_v22 = vpop.f32.mrb[50].mxu0 }
 0x333   : > { %v1230_v23 = vpack.c.bf16 %v2144_v22, %v2143_v20  ;;  %v1161_v24 = vpop.f32.mrb[51].mxu0 }
 0x334   : > { %v1229_v25 = vpack.c.bf16 %v1161_v24, %v1158_v21 }
 0x335   : > { %1246 = vst [vmem:[#allocation2 + $0x48] sm:$0xff] %v1230_v23 }
 0x336   : > { %1245 = vst [vmem:[#allocation2 + $0x40] sm:$0xff] %v1229_v25 }
 0x340   : > { %v2147_v26 = vpop.f32.mrb[52].mxu0 }
 0x341   : > { %v1174_v27 = vpop.f32.mrb[53].mxu0 }
 0x342   : > { %v2148_v28 = vpop.f32.mrb[54].mxu0 }
 0x343   : > { %v1232_v29 = vpack.c.bf16 %v2148_v28, %v2147_v26  ;;  %v1177_v30 = vpop.f32.mrb[55].mxu0 }
 0x344   : > { %v1231_v31 = vpack.c.bf16 %v1177_v30, %v1174_v27 }
 0x345   : > { %1248 = vst [vmem:[#allocation2 + $0x58] sm:$0xff] %v1232_v29 }
 0x346   : > { %1247 = vst [vmem:[#allocation2 + $0x50] sm:$0xff] %v1231_v31 }
 0x350   : > { %v2151_v32 = vpop.f32.mrb[56].mxu0 }
 0x351   : > { %v1190_v33 = vpop.f32.mrb[57].mxu0 }
 0x352   : > { %v2152_v34 = vpop.f32.mrb[58].mxu0 }
 0x353   : > { %v1234_v35 = vpack.c.bf16 %v2152_v34, %v2151_v32  ;;  %v1193_v36 = vpop.f32.mrb[59].mxu0 }
 0x354   : > { %v1233_v37 = vpack.c.bf16 %v1193_v36, %v1190_v33 }
 0x355   : > { %1250 = vst [vmem:[#allocation2 + $0x68] sm:$0xff] %v1234_v35 }
 0x356   : > { %1249 = vst [vmem:[#allocation2 + $0x60] sm:$0xff] %v1233_v37 }
 0x360   : > { %v2155_v38 = vpop.f32.mrb[60].mxu0 }
 0x361   : > { %v1206_v39 = vpop.f32.mrb[61].mxu0 }
 0x362   : > { %v2156_v40 = vpop.f32.mrb[62].mxu0 }
 0x363   : > { %v1236_v41 = vpack.c.bf16 %v2156_v40, %v2155_v38  ;;  %v1209_v42 = vpop.f32.mrb[63].mxu0 }
 0x364   : > { %v1235_v43 = vpack.c.bf16 %v1209_v42, %v1206_v39 }
 0x365   : > { %1252 = vst [vmem:[#allocation2 + $0x78] sm:$0xff] %v1236_v41 }
 0x366   : > { %1251 = vst [vmem:[#allocation2 + $0x70] sm:$0xff] %v1235_v43 }
 0x367 PF: > { %v1283_v44 = vld [vmem:[#allocation2 + $0x40] sm:$0xff]  ;;  %v1284_v46 = vld [vmem:[#allocation2 + $0x48] sm:$0xff]  ;;  %s1748_s21 = sshll.u32 %s2325_s19, 7  ;;  %v1285_v48 = vld [vmem:[#allocation2 + $0x50] sm:$0xff]  ;;  %v1484_v12 = vlaneseq }
 0x368   : > { %v1275_v45 = vld [vmem:[#allocation2] sm:$0xff]  ;;  %2005 = vmatprep.subr.bf16.mxu0 %v1283_v44  ;;  %2157 = vmatprep.subr.bf16.mxu1 %v1283_v44  ;;  %v1276_v47 = vld [vmem:[#allocation2 + $0x8] sm:$0xff]  ;;  %s2541_s24 = scalar_lea.vmem %s2622_s1, %s1748_s21  ;;  %v1277_v50 = vld [vmem:[#allocation2 + $0x10] sm:$0xff] }
 0x369   : > { %2006 = vmatpush3.bf16.msra.mxu0 %v1275_v45  ;;  %2165 = vmatpush3.bf16.msra.mxu1 %v1275_v45  ;;  %v2259_v49 = vld [vmem:[%s2541_s24 + $0x4] ss:$8 sps:$4 sm:$0xff]   ;;  %v1286_v52 = vld [vmem:[#allocation2 + $0x58] sm:$0xff]  ;;  %v1281_v59 = vld [vmem:[#allocation2 + $0x30] sm:$0xff]  ;;  %v2559_v13 = vand.u32 127, %v1484_v12 }
 0x36a   : > { %2007 = vmatprep.subr.bf16.mxu0 %v1284_v46  ;;  %2158 = vmatprep.subr.bf16.mxu1 %v1284_v46  ;;  %v2262_v51 = vld [vmem:[%s2541_s24 + $0x44] ss:$8 sps:$4 sm:$0xff]   ;;  %v1278_v53 = vld [vmem:[#allocation2 + $0x18] sm:$0xff]  ;;  %v2257_v62 = vld [vmem:[%s2541_s24] ss:$8 sps:$4 sm:$0xff]  }
 0x36b   : > { %1403 = vmatprep.mubr.bf16.mxu0 %v2259_v49  ;;  %1435 = vmatprep.mubr.bf16.mxu1 %v2262_v51  ;;  %v1287_v54 = vld [vmem:[#allocation2 + $0x60] sm:$0xff]  ;;  %v1288_v56 = vld [vmem:[#allocation2 + $0x68] sm:$0xff]  ;;  %v1282_v61 = vld [vmem:[#allocation2 + $0x38] sm:$0xff]  ;;  %vm1486_vm1 = vcmp.lt.s32.totalorder %v2559_v13, 32 }
 0x36c   : > { %v1279_v55 = vld [vmem:[#allocation2 + $0x20] sm:$0xff]  ;;  %v1280_v57 = vld [vmem:[#allocation2 + $0x28] sm:$0xff]  ;;  %v1290_v60 = vld [vmem:[#allocation2 + $0x78] sm:$0xff] }
 0x36d   : > { %2008 = vmatpush3.bf16.msra.mxu0 %v1276_v47  ;;  %2166 = vmatpush3.bf16.msra.mxu1 %v1276_v47  ;;  %v1289_v58 = vld [vmem:[#allocation2 + $0x70] sm:$0xff]  ;;  %v2260_v63 = vld [vmem:[%s2541_s24 + $0x40] ss:$8 sps:$4 sm:$0xff]   ;;  %v2269_v4 = vld [vmem:[%s2541_s24 + $0x24] ss:$8 sps:$4 sm:$0xff]  }
 0x36e   : > { %2009 = vmatprep.subr.bf16.mxu0 %v1285_v48  ;;  %2159 = vmatprep.subr.bf16.mxu1 %v1285_v48  ;;  %v2263_v0 = vld [vmem:[%s2541_s24 + $0x14] ss:$8 sps:$4 sm:$0xff]   ;;  %v2267_v2 = vld [vmem:[%s2541_s24 + $0x10] ss:$8 sps:$4 sm:$0xff]   ;;  %v2271_v5 = vld [vmem:[%s2541_s24 + $0x64] ss:$8 sps:$4 sm:$0xff]  }
 0x36f   : > { %v2265_v1 = vld [vmem:[%s2541_s24 + $0x54] ss:$8 sps:$4 sm:$0xff]   ;;  %v2268_v3 = vld [vmem:[%s2541_s24 + $0x50] ss:$8 sps:$4 sm:$0xff]   ;;  %v2273_v6 = vld [vmem:[%s2541_s24 + $0x20] ss:$8 sps:$4 sm:$0xff]  }
 0x370   : > { %v2274_v7 = vld [vmem:[%s2541_s24 + $0x60] ss:$8 sps:$4 sm:$0xff]   ;;  %v2275_v8 = vld [vmem:[%s2541_s24 + $0x34] ss:$8 sps:$4 sm:$0xff]   ;;  %v2279_v10 = vld [vmem:[%s2541_s24 + $0x30] ss:$8 sps:$4 sm:$0xff]  }
 0x371   : > { %2010 = vmatpush3.bf16.msra.mxu0 %v1277_v50  ;;  %2167 = vmatpush3.bf16.msra.mxu1 %v1277_v50  ;;  %v2277_v9 = vld [vmem:[%s2541_s24 + $0x74] ss:$8 sps:$4 sm:$0xff]   ;;  %v2280_v11 = vld [vmem:[%s2541_s24 + $0x70] ss:$8 sps:$4 sm:$0xff]  }
 0x372   : > { %2011 = vmatprep.subr.bf16.mxu0 %v1286_v52  ;;  %2160 = vmatprep.subr.bf16.mxu1 %v1286_v52 }
 0x375   : > { %2012 = vmatpush3.bf16.msra.mxu0 %v1278_v53  ;;  %2168 = vmatpush3.bf16.msra.mxu1 %v1278_v53 }
 0x376   : > { %2013 = vmatprep.subr.bf16.mxu0 %v1287_v54  ;;  %2161 = vmatprep.subr.bf16.mxu1 %v1287_v54 }
 0x379   : > { %2014 = vmatpush3.bf16.msra.mxu0 %v1279_v55  ;;  %2169 = vmatpush3.bf16.msra.mxu1 %v1279_v55 }
 0x37a   : > { %2015 = vmatprep.subr.bf16.mxu0 %v1288_v56  ;;  %2162 = vmatprep.subr.bf16.mxu1 %v1288_v56 }
 0x37d   : > { %2016 = vmatpush3.bf16.msra.mxu0 %v1280_v57  ;;  %2170 = vmatpush3.bf16.msra.mxu1 %v1280_v57 }
 0x37e   : > { %2017 = vmatprep.subr.bf16.mxu0 %v1289_v58  ;;  %2163 = vmatprep.subr.bf16.mxu1 %v1289_v58 }
 0x381   : > { %2018 = vmatpush3.bf16.msra.mxu0 %v1281_v59  ;;  %2171 = vmatpush3.bf16.msra.mxu1 %v1281_v59 }
 0x382   : > { %2019 = vmatprep.subr.bf16.mxu0 %v1290_v60  ;;  %2164 = vmatprep.subr.bf16.mxu1 %v1290_v60 }
 0x385   : > { %2020 = vmatpush3.bf16.msra.mxu0 %v1282_v61  ;;  %2172 = vmatpush3.bf16.msra.mxu1 %v1282_v61 }
 0x388   : > { %1404 = vmatmul.mubr.bf16.vlgmr.msra.gmra.mrb[0].mxu0 %v2257_v62  ;;  %1436 = vmatmul.mubr.bf16.vlgmr.msra.gmra.mrb[0].mxu1 %v2260_v63 }
 0x389   : > { %1411 = vmatprep.mubr.bf16.mxu0 %v2263_v0  ;;  %1443 = vmatprep.mubr.bf16.mxu1 %v2265_v1 }
 0x390   : > { %1412 = vmatmul.mubr.bf16.gmra.mrb[4].mxu0 %v2267_v2  ;;  %1444 = vmatmul.mubr.bf16.gmra.mrb[4].mxu1 %v2268_v3 }
 0x391   : > { %1419 = vmatprep.mubr.bf16.mxu0 %v2269_v4  ;;  %1451 = vmatprep.mubr.bf16.mxu1 %v2271_v5 }
 0x398   : > { %1420 = vmatmul.mubr.bf16.gmra.mrb[8].mxu0 %v2273_v6  ;;  %1452 = vmatmul.mubr.bf16.gmra.mrb[8].mxu1 %v2274_v7 }
 0x399   : > { %1427 = vmatprep.mubr.bf16.mxu0 %v2275_v8  ;;  %1459 = vmatprep.mubr.bf16.mxu1 %v2277_v9 }
 0x3a0   : > { %1428 = vmatmul.mubr.bf16.gmra.mrb[12].mxu0 %v2279_v10  ;;  %1460 = vmatmul.mubr.bf16.gmra.mrb[12].mxu1 %v2280_v11 }
 0x45b   : > { %v2021_v14 = vpop.f32.mrb[0].mxu0  ;;  %v2045_v15 = vpop.f32.mrb[0].mxu1 }
 0x45c   : > { %v2022_v16 = vpop.f32.mrb[1].mxu0  ;;  %v2046_v17 = vpop.f32.mrb[1].mxu1 }
 0x45d   : > { %v2023_v18 = vadd.f32 %v2022_v16, %v2021_v14  ;;  %v2047_v19 = vadd.f32 %v2046_v17, %v2045_v15  ;;  %v2024_v20 = vpop.f32.mrb[2].mxu0  ;;  %v2048_v21 = vpop.f32.mrb[2].mxu1 }
 0x45e   : > { %v2025_v22 = vpop.f32.mrb[3].mxu0  ;;  %v2049_v23 = vpop.f32.mrb[3].mxu1 }
 0x45f   : > { %1468 = vst [vmem:[%s2333_s25] sm:$0xff] %v2023_v18  ;;  %1476 = vst [vmem:[%s2333_s25 + $0x40] sm:$0xff] %v2047_v19  ;;  %v2026_v24 = vadd.f32 %v2025_v22, %v2024_v20  ;;  %v2050_v25 = vadd.f32 %v2049_v23, %v2048_v21  ;;  %v1487_v26 = vsel %vm1486_vm1, %v2023_v18, 0.0  ;;  %v1495_v27 = vsel %vm1486_vm1, %v2047_v19, 0.0 }
 0x461   : > { %1469 = vst [vmem:[%s2333_s25 + $0x8] sm:$0xff] %v2026_v24  ;;  %v1488_v28 = vsel %vm1486_vm1, %v2026_v24, 0.0  ;;  %1477 = vst [vmem:[%s2333_s25 + $0x48] sm:$0xff] %v2050_v25  ;;  %v1496_v29 = vsel %vm1486_vm1, %v2050_v25, 0.0 }
 0x462   : > { %v1805_v30 = vpack.c.bf16 %v1488_v28, %v1487_v26  ;;  %v1825_v31 = vpack.c.bf16 %v1496_v29, %v1495_v27 }
 0x463   : > { %v2027_v32 = vpop.f32.mrb[4].mxu0  ;;  %v2051_v33 = vpop.f32.mrb[4].mxu1 }
 0x464   : > { %1806 = vst [vmem:[%s2338_s28] sm:$0xff] %v1805_v30   ;;  %1845 = vst [vmem:[%s2338_s28 + $0x20] sm:$0xff] %v1825_v31   ;;  %v2028_v34 = vpop.f32.mrb[5].mxu0  ;;  %v2052_v35 = vpop.f32.mrb[5].mxu1 }
 0x465   : > { %v2029_v36 = vadd.f32 %v2028_v34, %v2027_v32  ;;  %v2053_v37 = vadd.f32 %v2052_v35, %v2051_v33  ;;  %v2030_v38 = vpop.f32.mrb[6].mxu0  ;;  %v2054_v39 = vpop.f32.mrb[6].mxu1 }
 0x466   : > { %v2031_v40 = vpop.f32.mrb[7].mxu0  ;;  %v2055_v41 = vpop.f32.mrb[7].mxu1 }
 0x467   : > { %1470 = vst [vmem:[%s2333_s25 + $0x10] sm:$0xff] %v2029_v36  ;;  %1478 = vst [vmem:[%s2333_s25 + $0x50] sm:$0xff] %v2053_v37  ;;  %v2032_v42 = vadd.f32 %v2031_v40, %v2030_v38  ;;  %v2056_v43 = vadd.f32 %v2055_v41, %v2054_v39  ;;  %v1489_v44 = vsel %vm1486_vm1, %v2029_v36, 0.0  ;;  %v1497_v45 = vsel %vm1486_vm1, %v2053_v37, 0.0 }
 0x469   : > { %1471 = vst [vmem:[%s2333_s25 + $0x18] sm:$0xff] %v2032_v42  ;;  %v1490_v46 = vsel %vm1486_vm1, %v2032_v42, 0.0  ;;  %1479 = vst [vmem:[%s2333_s25 + $0x58] sm:$0xff] %v2056_v43  ;;  %v1498_v47 = vsel %vm1486_vm1, %v2056_v43, 0.0 }
 0x46a   : > { %v1810_v48 = vpack.c.bf16 %v1490_v46, %v1489_v44  ;;  %v1830_v49 = vpack.c.bf16 %v1498_v47, %v1497_v45 }
 0x46b   : > { %v2033_v50 = vpop.f32.mrb[8].mxu0  ;;  %v2057_v51 = vpop.f32.mrb[8].mxu1 }
 0x46c   : > { %1842 = vst [vmem:[%s2338_s28 + $0x8] sm:$0xff] %v1810_v48   ;;  %1846 = vst [vmem:[%s2338_s28 + $0x28] sm:$0xff] %v1830_v49   ;;  %v2034_v52 = vpop.f32.mrb[9].mxu0  ;;  %v2058_v53 = vpop.f32.mrb[9].mxu1 }
 0x46d   : > { %v2035_v54 = vadd.f32 %v2034_v52, %v2033_v50  ;;  %v2059_v55 = vadd.f32 %v2058_v53, %v2057_v51  ;;  %v2036_v56 = vpop.f32.mrb[10].mxu0  ;;  %v2060_v57 = vpop.f32.mrb[10].mxu1 }
 0x46e   : > { %v2037_v58 = vpop.f32.mrb[11].mxu0  ;;  %v2061_v59 = vpop.f32.mrb[11].mxu1 }
 0x46f   : > { %1472 = vst [vmem:[%s2333_s25 + $0x20] sm:$0xff] %v2035_v54  ;;  %1480 = vst [vmem:[%s2333_s25 + $0x60] sm:$0xff] %v2059_v55  ;;  %v2038_v60 = vadd.f32 %v2037_v58, %v2036_v56  ;;  %v2062_v61 = vadd.f32 %v2061_v59, %v2060_v57  ;;  %v1491_v62 = vsel %vm1486_vm1, %v2035_v54, 0.0  ;;  %v1499_v63 = vsel %vm1486_vm1, %v2059_v55, 0.0 }
 0x471   : > { %1473 = vst [vmem:[%s2333_s25 + $0x28] sm:$0xff] %v2038_v60  ;;  %v1492_v0 = vsel %vm1486_vm1, %v2038_v60, 0.0  ;;  %1481 = vst [vmem:[%s2333_s25 + $0x68] sm:$0xff] %v2062_v61  ;;  %v1500_v1 = vsel %vm1486_vm1, %v2062_v61, 0.0 }
 0x472   : > { %v1815_v2 = vpack.c.bf16 %v1492_v0, %v1491_v62  ;;  %v1835_v3 = vpack.c.bf16 %v1500_v1, %v1499_v63 }
 0x473   : > { %v2039_v4 = vpop.f32.mrb[12].mxu0  ;;  %v2063_v5 = vpop.f32.mrb[12].mxu1 }
 0x474   : > { %1843 = vst [vmem:[%s2338_s28 + $0x10] sm:$0xff] %v1815_v2   ;;  %1847 = vst [vmem:[%s2338_s28 + $0x30] sm:$0xff] %v1835_v3   ;;  %v2040_v6 = vpop.f32.mrb[13].mxu0  ;;  %v2064_v7 = vpop.f32.mrb[13].mxu1 }
 0x475   : > { %v2041_v8 = vadd.f32 %v2040_v6, %v2039_v4  ;;  %v2065_v9 = vadd.f32 %v2064_v7, %v2063_v5  ;;  %v2042_v10 = vpop.f32.mrb[14].mxu0  ;;  %v2066_v11 = vpop.f32.mrb[14].mxu1 }
 0x476   : > { %v2043_v12 = vpop.f32.mrb[15].mxu0  ;;  %v2067_v14 = vpop.f32.mrb[15].mxu1 }
 0x477   : > { %1474 = vst [vmem:[%s2333_s25 + $0x30] sm:$0xff] %v2041_v8  ;;  %1482 = vst [vmem:[%s2333_s25 + $0x70] sm:$0xff] %v2065_v9  ;;  %v2044_v15 = vadd.f32 %v2043_v12, %v2042_v10  ;;  %v2068_v16 = vadd.f32 %v2067_v14, %v2066_v11  ;;  %v1493_v17 = vsel %vm1486_vm1, %v2041_v8, 0.0  ;;  %v1501_v18 = vsel %vm1486_vm1, %v2065_v9, 0.0 }
 0x479   : > { %1475 = vst [vmem:[%s2333_s25 + $0x38] sm:$0xff] %v2044_v15  ;;  %v1494_v19 = vsel %vm1486_vm1, %v2044_v15, 0.0  ;;  %1483 = vst [vmem:[%s2333_s25 + $0x78] sm:$0xff] %v2068_v16  ;;  %v1502_v20 = vsel %vm1486_vm1, %v2068_v16, 0.0 }
 0x47a   : > { %v1820_v21 = vpack.c.bf16 %v1494_v19, %v1493_v17  ;;  %v1840_v22 = vpack.c.bf16 %v1502_v20, %v1501_v18 }
 0x47c   : > { %1844 = vst [vmem:[%s2338_s28 + $0x18] sm:$0xff] %v1820_v21   ;;  %1848 = vst [vmem:[%s2338_s28 + $0x38] sm:$0xff] %v1840_v22  }
 0x47d PF: > { %s16_s18 = sadd.s32 1, %s2287_s18  }
 0x47e   : > { %p13_p5 = scmp.ge.s32.totalorder %s16_s18, 4  }
 0x480   :  { %15 = sbr.rel (!%p13_p5) target bundleno = 1 (0x1), region = 80 }

</bundles_post_ra>
